<compile_context>
chip_gen: v7x
topology: tpu7x:2x2x1
jax: 0.10.0
libtpu: 0.0.40
codegen_flags: <defaults>
</compile_context>

<pallas_src>
import math
import functools

import jax
import jax.numpy as jnp
import numpy as np
from jax.experimental import pallas as pl
from jax.experimental.pallas import tpu as pltpu

LN_EPS = 1e-5
NEG_INF = -1e30


# ----------------------------- shared math helpers -----------------------------
def _layernorm(x, g, b):
    mu = jnp.mean(x, axis=-1, keepdims=True)
    var = jnp.mean((x - mu) ** 2, axis=-1, keepdims=True)
    return (x - mu) * jax.lax.rsqrt(var + LN_EPS) * g + b


def _gelu_exact(x):
    # nn.GELU() default = exact (erf) GELU; activation path stays in f32.
    return 0.5 * x * (1.0 + jax.lax.erf(x * (1.0 / math.sqrt(2.0))))


# ----------------------------- fused Pallas kernel -----------------------------
def gpt_fused_kernel(x_ref, maskb_ref,
                     ln1g_ref, ln1b_ref,
                     wqkv_ref, wo_ref, bo_ref,
                     ln2g_ref, ln2b_ref,
                     w1_ref, b1_ref, w2_ref, b2_ref,
                     olng_ref, olnb_ref,
                     out_ref, act_ref, *, num_heads, approx_recip):
    layer = pl.program_id(1)
    num_layers = pl.num_programs(1)

    # Load the batch-tile (flattened to rows) into the resident activation
    # buffer on layer 0; it stays in VMEM for the whole layer stack.
    @pl.when(layer == 0)
    def _():
        act_ref[...] = x_ref[0]

    x = act_ref[...]                       # (M, D) f32, M = B_tile * T
    M, D = x.shape
    H = num_heads
    DH = D // H
    cdt = wqkv_ref.dtype                   # matmul operand dtype (f32 or bf16)

    # ---------------- attention sub-block ----------------
    h = _layernorm(x, ln1g_ref[0], ln1b_ref[0]).astype(cdt)        # (M, D), one cast
    # Fused, lane-dense QKV projection (scale folded into Q columns on host).
    qkv = jnp.dot(h, wqkv_ref[0], preferred_element_type=jnp.float32)   # (M, 3D)
    mask = maskb_ref[...]                                          # (M, M) block-diag causal bias

    heads = []
    for hh in range(H):                    # tiny per-head score/PV work (T is small)
        q = qkv[:, hh * DH:(hh + 1) * DH].astype(cdt)              # (M, DH)
        k = qkv[:, D + hh * DH:D + (hh + 1) * DH].astype(cdt)      # (M, DH)
        v = qkv[:, 2 * D + hh * DH:2 * D + (hh + 1) * DH].astype(cdt)
        s = jnp.einsum('tk,sk->ts', q, k,
                       preferred_element_type=jnp.float32) + mask  # (M, M)
        s = s - jnp.max(s, axis=-1, keepdims=True)
        p = jnp.exp(s)
        denom = jnp.sum(p, axis=-1, keepdims=True)
        if approx_recip:
            p = p * pl.reciprocal(denom, approx=True)              # EUP slot
        else:
            p = p / denom
        heads.append(jnp.dot(p.astype(cdt), v,
                             preferred_element_type=jnp.float32))  # (M, DH)

    y = jnp.concatenate(heads, axis=-1).astype(cdt)                # (M, D), head-major
    # Single output projection; cross-head reduction happens inside the MXU.
    y = jnp.dot(y, wo_ref[0], preferred_element_type=jnp.float32) + bo_ref[0]
    x = x + y                                                      # residual 1

    # ---------------- MLP sub-block ----------------
    h2 = _layernorm(x, ln2g_ref[0], ln2b_ref[0]).astype(cdt)
    m = jnp.dot(h2, w1_ref[0], preferred_element_type=jnp.float32) + b1_ref[0]
    m = _gelu_exact(m).astype(cdt)
    m = jnp.dot(m, w2_ref[0], preferred_element_type=jnp.float32) + b2_ref[0]
    x = x + m                                                      # residual 2

    act_ref[...] = x

    # Final output LayerNorm, written once per batch group.
    @pl.when(layer == num_layers - 1)
    def _():
        out_ref[0] = _layernorm(x, olng_ref[...], olnb_ref[...])


# ----------------------------- host helpers -----------------------------
def _block_causal_bias(b_tile, T):
    """Additive bias for the folded batch tile: causal within each batch
    element, -inf across batch elements (block-diagonal)."""
    M = b_tile * T
    r = np.arange(M)
    same_b = (r[:, None] // T) == (r[None, :] // T)
    causal = r[:, None] >= r[None, :]
    return jnp.asarray(np.where(same_b & causal, 0.0, NEG_INF), jnp.float32)


def _vmem_limit_bytes(kparams, M, D):
    """Explicit scoped-VMEM budget: 2x (double-buffered) per-layer weight
    block + resident blocks/scratch + intermediates + margin."""
    per_layer = 0
    for k in ('ln1_g', 'ln1_b', 'wqkv_t', 'wo_t', 'bo',
              'ln2_g', 'ln2_b', 'w1_t', 'b1', 'w2_t', 'b2'):
        a = kparams[k]
        per_layer += int(np.prod(a.shape[1:])) * a.dtype.itemsize
    f32 = 4
    resident = (M * M + 2 * D + M * D) * f32            # mask + out-LN + act scratch
    io_blocks = 2 * 2 * (M * D) * f32                   # x / out blocks, double-buffered
    interm = (M * 3 * D + 2 * M * 4 * D + 4 * M * D + 4 * M * M) * f32
    est = 2 * per_layer + resident + io_blocks + interm + (4 << 20)
    return int(min(est, 64 * 1024 * 1024))              # stay within v7x physical VMEM


# ----------------------------- wrapper -----------------------------
def gpt_backbone_forward(x, kparams, num_heads, b_tile=None, approx_recip=True):
    B, T, D = x.shape
    L = kparams['wqkv_t'].shape[0]
    if b_tile is None:
        b_tile = B
    assert B % b_tile == 0, "batch must be divisible by b_tile"
    G = B // b_tile
    M = b_tile * T

    x_rows = x.reshape(G, M, D)                          # host-side row folding (free)
    mask = _block_causal_bias(b_tile, T)

    kernel = functools.partial(gpt_fused_kernel, num_heads=num_heads,
                               approx_recip=approx_recip)

    def wspec(shape):
        # Per-layer weight/bias: leading layer index, rest of the array whole.
        nrest = len(shape) - 1
        return pl.BlockSpec((1,) + tuple(shape[1:]),
                            lambda g, l, _n=nrest: (l,) + (0,) * _n)

    def cspec(shape):
        # Grid-invariant block (DMA'd once, stays resident in VMEM).
        return pl.BlockSpec(tuple(shape), lambda g, l, _n=len(shape): (0,) * _n)

    out = pl.pallas_call(
        kernel,
        grid=(G, L),
        in_specs=[
            pl.BlockSpec((1, M, D), lambda g, l: (g, 0, 0)),   # x rows (resident per g)
            cspec(mask.shape),                                 # block-diag causal bias
            wspec(kparams['ln1_g'].shape), wspec(kparams['ln1_b'].shape),
            wspec(kparams['wqkv_t'].shape), wspec(kparams['wo_t'].shape),
            wspec(kparams['bo'].shape),
            wspec(kparams['ln2_g'].shape), wspec(kparams['ln2_b'].shape),
            wspec(kparams['w1_t'].shape), wspec(kparams['b1'].shape),
            wspec(kparams['w2_t'].shape), wspec(kparams['b2'].shape),
            cspec(kparams['oln_g'].shape), cspec(kparams['oln_b'].shape),
        ],
        out_specs=pl.BlockSpec((1, M, D), lambda g, l: (g, 0, 0)),
        out_shape=jax.ShapeDtypeStruct((G, M, D), jnp.float32),
        scratch_shapes=[pltpu.VMEM((M, D), jnp.float32)],      # resident activation
        compiler_params=pltpu.CompilerParams(
            dimension_semantics=("parallel", "arbitrary"),
            vmem_limit_bytes=_vmem_limit_bytes(kparams, M, D)),
    )(x_rows, mask,
      kparams['ln1_g'], kparams['ln1_b'],
      kparams['wqkv_t'], kparams['wo_t'], kparams['bo'],
      kparams['ln2_g'], kparams['ln2_b'],
      kparams['w1_t'], kparams['b1'], kparams['w2_t'], kparams['b2'],
      kparams['oln_g'], kparams['oln_b'])

    return out.reshape(B, T, D)


# ------------------- host-side weight restructuring (offline layout work) -------------------
def prepare_kernel_params(layer_params, out_ln, num_heads, weight_dtype=jnp.float32):
    L = len(layer_params)
    D = layer_params[0]['wo'].shape[0]
    DH = D // num_heads
    scale = 1.0 / math.sqrt(DH)

    def stack(key):
        return jnp.stack([p[key] for p in layer_params], axis=0)

    # Fused QKV weight, transposed to (D, 3D); fold 1/sqrt(DH) into Q columns.
    wqkv_t = jnp.transpose(stack('wqkv'), (0, 2, 1))             # (L, D, 3D)
    col_scale = jnp.concatenate([jnp.full((D,), scale, jnp.float32),
                                 jnp.ones((2 * D,), jnp.float32)])
    wqkv_t = wqkv_t * col_scale[None, None, :]

    return {
        'ln1_g': stack('ln1_g'), 'ln1_b': stack('ln1_b'),        # (L, 1, D)
        'wqkv_t': wqkv_t.astype(weight_dtype),                   # (L, D, 3D)
        'wo_t': jnp.transpose(stack('wo'), (0, 2, 1)).astype(weight_dtype),  # (L, D, D)
        'bo': stack('bo'),                                       # (L, 1, D)
        'ln2_g': stack('ln2_g'), 'ln2_b': stack('ln2_b'),
        'w1_t': jnp.transpose(stack('w1'), (0, 2, 1)).astype(weight_dtype),  # (L, D, 4D)
        'b1': stack('b1'),                                       # (L, 1, 4D)
        'w2_t': jnp.transpose(stack('w2'), (0, 2, 1)).astype(weight_dtype),  # (L, 4D, D)
        'b2': stack('b2'),                                       # (L, 1, D)
        'oln_g': out_ln['g'], 'oln_b': out_ln['b'],              # (1, D)
    }


# ----------------------------- parameter init (deterministic) -----------------------------
def init_params(key, D, num_layers):
    # Matches GPT_Backbone._init_weights: Linear weight ~ N(0, 0.02), bias=0,
    # LayerNorm weight=1, bias=0.  Weights kept in PyTorch (out, in) layout here.
    layers = []
    for _ in range(num_layers):
        key, k0, k1, k2, k3 = jax.random.split(key, 5)
        layers.append({
            'ln1_g': jnp.ones((1, D), jnp.float32),
            'ln1_b': jnp.zeros((1, D), jnp.float32),
            'wqkv': 0.02 * jax.random.normal(k0, (3 * D, D), jnp.float32),
            'wo': 0.02 * jax.random.normal(k1, (D, D), jnp.float32),
            'bo': jnp.zeros((1, D), jnp.float32),
            'ln2_g': jnp.ones((1, D), jnp.float32),
            'ln2_b': jnp.zeros((1, D), jnp.float32),
            'w1': 0.02 * jax.random.normal(k2, (4 * D, D), jnp.float32),
            'b1': jnp.zeros((1, 4 * D), jnp.float32),
            'w2': 0.02 * jax.random.normal(k3, (D, 4 * D), jnp.float32),
            'b2': jnp.zeros((1, D), jnp.float32),
        })
    out_ln = {'g': jnp.ones((1, D), jnp.float32),
              'b': jnp.zeros((1, D), jnp.float32)}
    return layers, out_ln


# ----------------------------- pure-JAX reference -----------------------------
def _ref_block(x, p, num_heads):
    B, T, D = x.shape
    DH = D // num_heads
    h = _layernorm(x, p['ln1_g'][0], p['ln1_b'][0])
    qkv = h @ p['wqkv'].T
    q, k, v = jnp.split(qkv, 3, axis=-1)
    q = q.reshape(B, T, num_heads, DH).transpose(0, 2, 1, 3)
    k = k.reshape(B, T, num_heads, DH).transpose(0, 2, 1, 3)
    v = v.reshape(B, T, num_heads, DH).transpose(0, 2, 1, 3)
    att = jnp.einsum('bhtd,bhsd->bhts', q, k) / math.sqrt(DH)
    causal = jnp.tril(jnp.ones((T, T), bool))
    att = jnp.where(causal, att, -jnp.inf)
    att = jax.nn.softmax(att, axis=-1)
    y = jnp.einsum('bhts,bhsd->bhtd', att, v)
    y = y.transpose(0, 2, 1, 3).reshape(B, T, D)
    y = y @ p['wo'].T + p['bo'][0]
    x = x + y
    h2 = _layernorm(x, p['ln2_g'][0], p['ln2_b'][0])
    m = _gelu_exact(h2 @ p['w1'].T + p['b1'][0])
    m = m @ p['w2'].T + p['b2'][0]
    return x + m


def gpt_backbone_ref(x, layer_params, out_ln, num_heads):
    for p in layer_params:
        x = _ref_block(x, p, num_heads)
    return _layernorm(x, out_ln['g'][0], out_ln['b'][0])


# ----------------------------- main -----------------------------
if __name__ == "__main__":
    B = 4                 # batch
    T = 8                 # context_length
    D = 32                # embed_dim
    NUM_HEADS = 4         # num_heads (divides embed_dim)
    NUM_LAYERS = 3        # small stack for the test (module default is 6)
    B_TILE = 2            # batch elements folded into each grid step (G = 2 parallel tiles)

    key = jax.random.PRNGKey(0)
    key, kx, kp = jax.random.split(key, 3)
    x = jax.random.normal(kx, (B, T, D), jnp.float32)
    layer_params, out_ln = init_params(kp, D, NUM_LAYERS)

    ref = gpt_backbone_ref(x, layer_params, out_ln, NUM_HEADS)

    # f32 weights: tight match against the reference.
    kparams_f32 = prepare_kernel_params(layer_params, out_ln, NUM_HEADS,
                                        weight_dtype=jnp.float32)
    out = gpt_backbone_forward(x, kparams_f32, NUM_HEADS, b_tile=B_TILE,
                               approx_recip=True)
    out = jax.block_until_ready(out)
    # Only error sources vs the f32 reference: EUP approximate reciprocal in softmax.
    np.testing.assert_allclose(np.asarray(out), np.asarray(ref), atol=2e-3, rtol=2e-3)

    # bf16 matmul operands (deployment fast path): MXU-native, loose tolerance.
    kparams_bf16 = prepare_kernel_params(layer_params, out_ln, NUM_HEADS,
                                         weight_dtype=jnp.bfloat16)
    out_bf16 = gpt_backbone_forward(x, kparams_bf16, NUM_HEADS, b_tile=B_TILE,
                                    approx_recip=True)
    out_bf16 = jax.block_until_ready(out_bf16)
    np.testing.assert_allclose(np.asarray(out_bf16), np.asarray(ref),
                               atol=1e-1, rtol=1e-1)

    print("KERNEL_OK")
</pallas_src>

<mosaic_0001>
module attributes {stable_mosaic.version = 11 : i64} {
  func.func @gpt_fused_kernel(%arg0: i32, %arg1: i32, %arg2: memref<1x16x32xf32, #tpu.memory_space<vmem>>, %arg3: memref<16x16xf32, #tpu.memory_space<vmem>>, %arg4: memref<1x1x32xf32, #tpu.memory_space<vmem>>, %arg5: memref<1x1x32xf32, #tpu.memory_space<vmem>>, %arg6: memref<1x32x96xf32, #tpu.memory_space<vmem>>, %arg7: memref<1x32x32xf32, #tpu.memory_space<vmem>>, %arg8: memref<1x1x32xf32, #tpu.memory_space<vmem>>, %arg9: memref<1x1x32xf32, #tpu.memory_space<vmem>>, %arg10: memref<1x1x32xf32, #tpu.memory_space<vmem>>, %arg11: memref<1x32x128xf32, #tpu.memory_space<vmem>>, %arg12: memref<1x1x128xf32, #tpu.memory_space<vmem>>, %arg13: memref<1x128x32xf32, #tpu.memory_space<vmem>>, %arg14: memref<1x1x32xf32, #tpu.memory_space<vmem>>, %arg15: memref<1x32xf32, #tpu.memory_space<vmem>>, %arg16: memref<1x32xf32, #tpu.memory_space<vmem>>, %arg17: memref<1x16x32xf32, #tpu.memory_space<vmem>>, %arg18: memref<16x32xf32, #tpu.memory_space<vmem>>) attributes {dimension_semantics = [#tpu.dimension_semantics<parallel>, #tpu.dimension_semantics<arbitrary>], iteration_bounds = array<i64: 2, 3>, scalar_prefetch = 0 : i64, scratch_operands = 1 : i64, tpu.core_type = #tpu.core_type<tc>, window_params = [{transform_indices = @transform_0, window_bounds = array<i64: 1, 16, 32>}, {pipeline_mode = #tpu.pipeline_mode<synchronous>, transform_indices = @transform_1, window_bounds = array<i64: 16, 16>}, {transform_indices = @transform_2, window_bounds = array<i64: 1, 1, 32>}, {transform_indices = @transform_3, window_bounds = array<i64: 1, 1, 32>}, {transform_indices = @transform_4, window_bounds = array<i64: 1, 32, 96>}, {transform_indices = @transform_5, window_bounds = array<i64: 1, 32, 32>}, {transform_indices = @transform_6, window_bounds = array<i64: 1, 1, 32>}, {transform_indices = @transform_7, window_bounds = array<i64: 1, 1, 32>}, {transform_indices = @transform_8, window_bounds = array<i64: 1, 1, 32>}, {transform_indices = @transform_9, window_bounds = array<i64: 1, 32, 128>}, {transform_indices = @transform_10, window_bounds = array<i64: 1, 1, 128>}, {transform_indices = @transform_11, window_bounds = array<i64: 1, 128, 32>}, {transform_indices = @transform_12, window_bounds = array<i64: 1, 1, 32>}, {pipeline_mode = #tpu.pipeline_mode<synchronous>, transform_indices = @transform_13, window_bounds = array<i64: 1, 32>}, {pipeline_mode = #tpu.pipeline_mode<synchronous>, transform_indices = @transform_14, window_bounds = array<i64: 1, 32>}, {transform_indices = @transform_15, window_bounds = array<i64: 1, 16, 32>}]} {
    %c0_i32 = arith.constant 0 : i32
    %0 = arith.cmpi eq, %arg1, %c0_i32 : i32
    %1 = arith.extui %0 : i1 to i32
    %c0_i32_0 = arith.constant 0 : i32
    %2 = arith.cmpi ne, %1, %c0_i32_0 : i32
    scf.if %2 {
      %c0_72 = arith.constant 0 : index
      %c0_73 = arith.constant 0 : index
      %c0_74 = arith.constant 0 : index
      %160 = vector.load %arg2[%c0_72, %c0_73, %c0_74] : memref<1x16x32xf32, #tpu.memory_space<vmem>>, vector<1x16x32xf32>
      %161 = vector.shape_cast %160 : vector<1x16x32xf32> to vector<16x32xf32>
      %c0_75 = arith.constant 0 : index
      %c0_76 = arith.constant 0 : index
      %162 = vector.load %arg18[%c0_75, %c0_76] : memref<16x32xf32, #tpu.memory_space<vmem>>, vector<16x32xf32>
      tpu.vector_store %arg18[%c0_75, %c0_76], %161 {strides = array<i32>} : memref<16x32xf32, #tpu.memory_space<vmem>>, vector<16x32xf32>,
    } else {
    }
    %c0 = arith.constant 0 : index
    %c0_1 = arith.constant 0 : index
    %3 = vector.load %arg18[%c0, %c0_1] : memref<16x32xf32, #tpu.memory_space<vmem>>, vector<16x32xf32>
    %c0_2 = arith.constant 0 : index
    %c0_3 = arith.constant 0 : index
    %c0_4 = arith.constant 0 : index
    %4 = vector.load %arg4[%c0_2, %c0_3, %c0_4] : memref<1x1x32xf32, #tpu.memory_space<vmem>>, vector<1x1x32xf32>
    %5 = vector.shape_cast %4 : vector<1x1x32xf32> to vector<1x32xf32>
    %c0_5 = arith.constant 0 : index
    %c0_6 = arith.constant 0 : index
    %c0_7 = arith.constant 0 : index
    %6 = vector.load %arg5[%c0_5, %c0_6, %c0_7] : memref<1x1x32xf32, #tpu.memory_space<vmem>>, vector<1x1x32xf32>
    %7 = vector.shape_cast %6 : vector<1x1x32xf32> to vector<1x32xf32>
    %cst = arith.constant dense<0.000000e+00> : vector<16xf32>
    %8 = vector.multi_reduction <add>, %3, %cst [1] : vector<16x32xf32> to vector<16xf32>
    %9 = vector.shape_cast %8 : vector<16xf32> to vector<16x1xf32>
    %cst_8 = arith.constant 3.200000e+01 : f32
    %10 = vector.broadcast %cst_8 : f32 to vector<16x1xf32>
    %11 = arith.divf %9, %10 : vector<16x1xf32>
    %12 = vector.broadcast %11 : vector<16x1xf32> to vector<16x32xf32>
    %13 = arith.subf %3, %12 : vector<16x32xf32>
    %14 = arith.mulf %13, %13 : vector<16x32xf32>
    %cst_9 = arith.constant dense<0.000000e+00> : vector<16xf32>
    %15 = vector.multi_reduction <add>, %14, %cst_9 [1] : vector<16x32xf32> to vector<16xf32>
    %16 = vector.shape_cast %15 : vector<16xf32> to vector<16x1xf32>
    %cst_10 = arith.constant 3.200000e+01 : f32
    %17 = vector.broadcast %cst_10 : f32 to vector<16x1xf32>
    %18 = arith.divf %16, %17 : vector<16x1xf32>
    %19 = vector.broadcast %11 : vector<16x1xf32> to vector<16x32xf32>
    %20 = arith.subf %3, %19 : vector<16x32xf32>
    %cst_11 = arith.constant 9.99999974E-6 : f32
    %21 = vector.broadcast %cst_11 : f32 to vector<16x1xf32>
    %22 = arith.addf %18, %21 : vector<16x1xf32>
    %23 = math.rsqrt %22 : vector<16x1xf32>
    %24 = vector.broadcast %23 : vector<16x1xf32> to vector<16x32xf32>
    %25 = arith.mulf %20, %24 : vector<16x32xf32>
    %26 = vector.broadcast %5 : vector<1x32xf32> to vector<16x32xf32>
    %27 = arith.mulf %25, %26 : vector<16x32xf32>
    %28 = vector.broadcast %7 : vector<1x32xf32> to vector<16x32xf32>
    %29 = arith.addf %27, %28 : vector<16x32xf32>
    %c0_12 = arith.constant 0 : index
    %c0_13 = arith.constant 0 : index
    %c0_14 = arith.constant 0 : index
    %30 = vector.load %arg6[%c0_12, %c0_13, %c0_14] : memref<1x32x96xf32, #tpu.memory_space<vmem>>, vector<1x32x96xf32>
    %31 = vector.shape_cast %30 : vector<1x32x96xf32> to vector<32x96xf32>
    %cst_15 = arith.constant dense<0.000000e+00> : vector<16x96xf32>
    %32 = tpu.matmul %29, %31, %cst_15 {dimension_numbers = #tpu.dot_dimension_numbers<[1], [0], [0], [1], [0, 0, 1, 1], [], []>} : vector<16x32xf32>, vector<32x96xf32>, vector<16x96xf32> -> vector<16x96xf32>
    %c0_16 = arith.constant 0 : index
    %c0_17 = arith.constant 0 : index
    %33 = vector.load %arg3[%c0_16, %c0_17] : memref<16x16xf32, #tpu.memory_space<vmem>>, vector<16x16xf32>
    %34 = vector.extract_strided_slice %32 {offsets = [0, 0], sizes = [16, 8], strides = [1, 1]} : vector<16x96xf32> to vector<16x8xf32>
    %35 = vector.extract_strided_slice %32 {offsets = [0, 32], sizes = [16, 8], strides = [1, 1]} : vector<16x96xf32> to vector<16x8xf32>
    %36 = vector.extract_strided_slice %32 {offsets = [0, 64], sizes = [16, 8], strides = [1, 1]} : vector<16x96xf32> to vector<16x8xf32>
    "tpu.trace_start"() <{level = 10 : i32, message = "tk,sk->ts"}> : () -> ()
    %cst_18 = arith.constant dense<0.000000e+00> : vector<16x16xf32>
    %37 = tpu.matmul %34, %35, %cst_18 {dimension_numbers = #tpu.dot_dimension_numbers<[1], [1], [0], [0], [0, 0, 1, 0], [], []>} : vector<16x8xf32>, vector<16x8xf32>, vector<16x16xf32> -> vector<16x16xf32>
    "tpu.trace_stop"() : () -> ()
    %38 = arith.addf %37, %33 : vector<16x16xf32>
    %cst_19 = arith.constant dense<0xFF800000> : vector<16xf32>
    %39 = vector.multi_reduction <maximumf>, %38, %cst_19 [1] : vector<16x16xf32> to vector<16xf32>
    %40 = vector.shape_cast %39 : vector<16xf32> to vector<16x1xf32>
    %41 = vector.broadcast %40 : vector<16x1xf32> to vector<16x16xf32>
    %42 = arith.subf %38, %41 : vector<16x16xf32>
    %43 = math.exp %42 : vector<16x16xf32>
    %cst_20 = arith.constant dense<0.000000e+00> : vector<16xf32>
    %44 = vector.multi_reduction <add>, %43, %cst_20 [1] : vector<16x16xf32> to vector<16xf32>
    %45 = vector.shape_cast %44 : vector<16xf32> to vector<16x1xf32>
    %46 = tpu.reciprocal %45 {approx = true} : vector<16x1xf32> -> vector<16x1xf32>
    %47 = vector.broadcast %46 : vector<16x1xf32> to vector<16x16xf32>
    %48 = arith.mulf %43, %47 : vector<16x16xf32>
    %cst_21 = arith.constant dense<0.000000e+00> : vector<16x8xf32>
    %49 = tpu.matmul %48, %36, %cst_21 {dimension_numbers = #tpu.dot_dimension_numbers<[1], [0], [0], [1], [0, 0, 1, 1], [], []>} : vector<16x16xf32>, vector<16x8xf32>, vector<16x8xf32> -> vector<16x8xf32>
    %50 = vector.extract_strided_slice %32 {offsets = [0, 8], sizes = [16, 8], strides = [1, 1]} : vector<16x96xf32> to vector<16x8xf32>
    %51 = vector.extract_strided_slice %32 {offsets = [0, 40], sizes = [16, 8], strides = [1, 1]} : vector<16x96xf32> to vector<16x8xf32>
    %52 = vector.extract_strided_slice %32 {offsets = [0, 72], sizes = [16, 8], strides = [1, 1]} : vector<16x96xf32> to vector<16x8xf32>
    "tpu.trace_start"() <{level = 10 : i32, message = "tk,sk->ts"}> : () -> ()
    %cst_22 = arith.constant dense<0.000000e+00> : vector<16x16xf32>
    %53 = tpu.matmul %50, %51, %cst_22 {dimension_numbers = #tpu.dot_dimension_numbers<[1], [1], [0], [0], [0, 0, 1, 0], [], []>} : vector<16x8xf32>, vector<16x8xf32>, vector<16x16xf32> -> vector<16x16xf32>
    "tpu.trace_stop"() : () -> ()
    %54 = arith.addf %53, %33 : vector<16x16xf32>
    %cst_23 = arith.constant dense<0xFF800000> : vector<16xf32>
    %55 = vector.multi_reduction <maximumf>, %54, %cst_23 [1] : vector<16x16xf32> to vector<16xf32>
    %56 = vector.shape_cast %55 : vector<16xf32> to vector<16x1xf32>
    %57 = vector.broadcast %56 : vector<16x1xf32> to vector<16x16xf32>
    %58 = arith.subf %54, %57 : vector<16x16xf32>
    %59 = math.exp %58 : vector<16x16xf32>
    %cst_24 = arith.constant dense<0.000000e+00> : vector<16xf32>
    %60 = vector.multi_reduction <add>, %59, %cst_24 [1] : vector<16x16xf32> to vector<16xf32>
    %61 = vector.shape_cast %60 : vector<16xf32> to vector<16x1xf32>
    %62 = tpu.reciprocal %61 {approx = true} : vector<16x1xf32> -> vector<16x1xf32>
    %63 = vector.broadcast %62 : vector<16x1xf32> to vector<16x16xf32>
    %64 = arith.mulf %59, %63 : vector<16x16xf32>
    %cst_25 = arith.constant dense<0.000000e+00> : vector<16x8xf32>
    %65 = tpu.matmul %64, %52, %cst_25 {dimension_numbers = #tpu.dot_dimension_numbers<[1], [0], [0], [1], [0, 0, 1, 1], [], []>} : vector<16x16xf32>, vector<16x8xf32>, vector<16x8xf32> -> vector<16x8xf32>
    %66 = vector.extract_strided_slice %32 {offsets = [0, 16], sizes = [16, 8], strides = [1, 1]} : vector<16x96xf32> to vector<16x8xf32>
    %67 = vector.extract_strided_slice %32 {offsets = [0, 48], sizes = [16, 8], strides = [1, 1]} : vector<16x96xf32> to vector<16x8xf32>
    %68 = vector.extract_strided_slice %32 {offsets = [0, 80], sizes = [16, 8], strides = [1, 1]} : vector<16x96xf32> to vector<16x8xf32>
    "tpu.trace_start"() <{level = 10 : i32, message = "tk,sk->ts"}> : () -> ()
    %cst_26 = arith.constant dense<0.000000e+00> : vector<16x16xf32>
    %69 = tpu.matmul %66, %67, %cst_26 {dimension_numbers = #tpu.dot_dimension_numbers<[1], [1], [0], [0], [0, 0, 1, 0], [], []>} : vector<16x8xf32>, vector<16x8xf32>, vector<16x16xf32> -> vector<16x16xf32>
    "tpu.trace_stop"() : () -> ()
    %70 = arith.addf %69, %33 : vector<16x16xf32>
    %cst_27 = arith.constant dense<0xFF800000> : vector<16xf32>
    %71 = vector.multi_reduction <maximumf>, %70, %cst_27 [1] : vector<16x16xf32> to vector<16xf32>
    %72 = vector.shape_cast %71 : vector<16xf32> to vector<16x1xf32>
    %73 = vector.broadcast %72 : vector<16x1xf32> to vector<16x16xf32>
    %74 = arith.subf %70, %73 : vector<16x16xf32>
    %75 = math.exp %74 : vector<16x16xf32>
    %cst_28 = arith.constant dense<0.000000e+00> : vector<16xf32>
    %76 = vector.multi_reduction <add>, %75, %cst_28 [1] : vector<16x16xf32> to vector<16xf32>
    %77 = vector.shape_cast %76 : vector<16xf32> to vector<16x1xf32>
    %78 = tpu.reciprocal %77 {approx = true} : vector<16x1xf32> -> vector<16x1xf32>
    %79 = vector.broadcast %78 : vector<16x1xf32> to vector<16x16xf32>
    %80 = arith.mulf %75, %79 : vector<16x16xf32>
    %cst_29 = arith.constant dense<0.000000e+00> : vector<16x8xf32>
    %81 = tpu.matmul %80, %68, %cst_29 {dimension_numbers = #tpu.dot_dimension_numbers<[1], [0], [0], [1], [0, 0, 1, 1], [], []>} : vector<16x16xf32>, vector<16x8xf32>, vector<16x8xf32> -> vector<16x8xf32>
    %82 = vector.extract_strided_slice %32 {offsets = [0, 24], sizes = [16, 8], strides = [1, 1]} : vector<16x96xf32> to vector<16x8xf32>
    %83 = vector.extract_strided_slice %32 {offsets = [0, 56], sizes = [16, 8], strides = [1, 1]} : vector<16x96xf32> to vector<16x8xf32>
    %84 = vector.extract_strided_slice %32 {offsets = [0, 88], sizes = [16, 8], strides = [1, 1]} : vector<16x96xf32> to vector<16x8xf32>
    "tpu.trace_start"() <{level = 10 : i32, message = "tk,sk->ts"}> : () -> ()
    %cst_30 = arith.constant dense<0.000000e+00> : vector<16x16xf32>
    %85 = tpu.matmul %82, %83, %cst_30 {dimension_numbers = #tpu.dot_dimension_numbers<[1], [1], [0], [0], [0, 0, 1, 0], [], []>} : vector<16x8xf32>, vector<16x8xf32>, vector<16x16xf32> -> vector<16x16xf32>
    "tpu.trace_stop"() : () -> ()
    %86 = arith.addf %85, %33 : vector<16x16xf32>
    %cst_31 = arith.constant dense<0xFF800000> : vector<16xf32>
    %87 = vector.multi_reduction <maximumf>, %86, %cst_31 [1] : vector<16x16xf32> to vector<16xf32>
    %88 = vector.shape_cast %87 : vector<16xf32> to vector<16x1xf32>
    %89 = vector.broadcast %88 : vector<16x1xf32> to vector<16x16xf32>
    %90 = arith.subf %86, %89 : vector<16x16xf32>
    %91 = math.exp %90 : vector<16x16xf32>
    %cst_32 = arith.constant dense<0.000000e+00> : vector<16xf32>
    %92 = vector.multi_reduction <add>, %91, %cst_32 [1] : vector<16x16xf32> to vector<16xf32>
    %93 = vector.shape_cast %92 : vector<16xf32> to vector<16x1xf32>
    %94 = tpu.reciprocal %93 {approx = true} : vector<16x1xf32> -> vector<16x1xf32>
    %95 = vector.broadcast %94 : vector<16x1xf32> to vector<16x16xf32>
    %96 = arith.mulf %91, %95 : vector<16x16xf32>
    %cst_33 = arith.constant dense<0.000000e+00> : vector<16x8xf32>
    %97 = tpu.matmul %96, %84, %cst_33 {dimension_numbers = #tpu.dot_dimension_numbers<[1], [0], [0], [1], [0, 0, 1, 1], [], []>} : vector<16x16xf32>, vector<16x8xf32>, vector<16x8xf32> -> vector<16x8xf32>
    %98 = tpu.concatenate %49, %65, %81, %97 in 1 : vector<16x8xf32>, vector<16x8xf32>, vector<16x8xf32>, vector<16x8xf32> -> vector<16x32xf32>
    %c0_34 = arith.constant 0 : index
    %c0_35 = arith.constant 0 : index
    %c0_36 = arith.constant 0 : index
    %99 = vector.load %arg7[%c0_34, %c0_35, %c0_36] : memref<1x32x32xf32, #tpu.memory_space<vmem>>, vector<1x32x32xf32>
    %100 = vector.shape_cast %99 : vector<1x32x32xf32> to vector<32x32xf32>
    %cst_37 = arith.constant dense<0.000000e+00> : vector<16x32xf32>
    %101 = tpu.matmul %98, %100, %cst_37 {dimension_numbers = #tpu.dot_dimension_numbers<[1], [0], [0], [1], [0, 0, 1, 1], [], []>} : vector<16x32xf32>, vector<32x32xf32>, vector<16x32xf32> -> vector<16x32xf32>
    %c0_38 = arith.constant 0 : index
    %c0_39 = arith.constant 0 : index
    %c0_40 = arith.constant 0 : index
    %102 = vector.load %arg8[%c0_38, %c0_39, %c0_40] : memref<1x1x32xf32, #tpu.memory_space<vmem>>, vector<1x1x32xf32>
    %103 = vector.shape_cast %102 : vector<1x1x32xf32> to vector<1x32xf32>
    %104 = vector.broadcast %103 : vector<1x32xf32> to vector<16x32xf32>
    %105 = arith.addf %101, %104 : vector<16x32xf32>
    %106 = arith.addf %3, %105 : vector<16x32xf32>
    %c0_41 = arith.constant 0 : index
    %c0_42 = arith.constant 0 : index
    %c0_43 = arith.constant 0 : index
    %107 = vector.load %arg9[%c0_41, %c0_42, %c0_43] : memref<1x1x32xf32, #tpu.memory_space<vmem>>, vector<1x1x32xf32>
    %108 = vector.shape_cast %107 : vector<1x1x32xf32> to vector<1x32xf32>
    %c0_44 = arith.constant 0 : index
    %c0_45 = arith.constant 0 : index
    %c0_46 = arith.constant 0 : index
    %109 = vector.load %arg10[%c0_44, %c0_45, %c0_46] : memref<1x1x32xf32, #tpu.memory_space<vmem>>, vector<1x1x32xf32>
    %110 = vector.shape_cast %109 : vector<1x1x32xf32> to vector<1x32xf32>
    %cst_47 = arith.constant dense<0.000000e+00> : vector<16xf32>
    %111 = vector.multi_reduction <add>, %106, %cst_47 [1] : vector<16x32xf32> to vector<16xf32>
    %112 = vector.shape_cast %111 : vector<16xf32> to vector<16x1xf32>
    %cst_48 = arith.constant 3.200000e+01 : f32
    %113 = vector.broadcast %cst_48 : f32 to vector<16x1xf32>
    %114 = arith.divf %112, %113 : vector<16x1xf32>
    %115 = vector.broadcast %114 : vector<16x1xf32> to vector<16x32xf32>
    %116 = arith.subf %106, %115 : vector<16x32xf32>
    %117 = arith.mulf %116, %116 : vector<16x32xf32>
    %cst_49 = arith.constant dense<0.000000e+00> : vector<16xf32>
    %118 = vector.multi_reduction <add>, %117, %cst_49 [1] : vector<16x32xf32> to vector<16xf32>
    %119 = vector.shape_cast %118 : vector<16xf32> to vector<16x1xf32>
    %cst_50 = arith.constant 3.200000e+01 : f32
    %120 = vector.broadcast %cst_50 : f32 to vector<16x1xf32>
    %121 = arith.divf %119, %120 : vector<16x1xf32>
    %122 = vector.broadcast %114 : vector<16x1xf32> to vector<16x32xf32>
    %123 = arith.subf %106, %122 : vector<16x32xf32>
    %cst_51 = arith.constant 9.99999974E-6 : f32
    %124 = vector.broadcast %cst_51 : f32 to vector<16x1xf32>
    %125 = arith.addf %121, %124 : vector<16x1xf32>
    %126 = math.rsqrt %125 : vector<16x1xf32>
    %127 = vector.broadcast %126 : vector<16x1xf32> to vector<16x32xf32>
    %128 = arith.mulf %123, %127 : vector<16x32xf32>
    %129 = vector.broadcast %108 : vector<1x32xf32> to vector<16x32xf32>
    %130 = arith.mulf %128, %129 : vector<16x32xf32>
    %131 = vector.broadcast %110 : vector<1x32xf32> to vector<16x32xf32>
    %132 = arith.addf %130, %131 : vector<16x32xf32>
    %c0_52 = arith.constant 0 : index
    %c0_53 = arith.constant 0 : index
    %c0_54 = arith.constant 0 : index
    %133 = vector.load %arg11[%c0_52, %c0_53, %c0_54] : memref<1x32x128xf32, #tpu.memory_space<vmem>>, vector<1x32x128xf32>
    %134 = vector.shape_cast %133 : vector<1x32x128xf32> to vector<32x128xf32>
    %cst_55 = arith.constant dense<0.000000e+00> : vector<16x128xf32>
    %135 = tpu.matmul %132, %134, %cst_55 {dimension_numbers = #tpu.dot_dimension_numbers<[1], [0], [0], [1], [0, 0, 1, 1], [], []>} : vector<16x32xf32>, vector<32x128xf32>, vector<16x128xf32> -> vector<16x128xf32>
    %c0_56 = arith.constant 0 : index
    %c0_57 = arith.constant 0 : index
    %c0_58 = arith.constant 0 : index
    %136 = vector.load %arg12[%c0_56, %c0_57, %c0_58] : memref<1x1x128xf32, #tpu.memory_space<vmem>>, vector<1x1x128xf32>
    %137 = vector.shape_cast %136 : vector<1x1x128xf32> to vector<1x128xf32>
    %138 = vector.broadcast %137 : vector<1x128xf32> to vector<16x128xf32>
    %139 = arith.addf %135, %138 : vector<16x128xf32>
    %cst_59 = arith.constant 5.000000e-01 : f32
    %140 = vector.broadcast %cst_59 : f32 to vector<16x128xf32>
    %141 = arith.mulf %140, %139 : vector<16x128xf32>
    %cst_60 = arith.constant 0.707106769 : f32
    %142 = vector.broadcast %cst_60 : f32 to vector<16x128xf32>
    %143 = arith.mulf %139, %142 : vector<16x128xf32>
    %144 = math.erf %143 : vector<16x128xf32>
    %cst_61 = arith.constant 1.000000e+00 : f32
    %145 = vector.broadcast %cst_61 : f32 to vector<16x128xf32>
    %146 = arith.addf %145, %144 : vector<16x128xf32>
    %147 = arith.mulf %141, %146 : vector<16x128xf32>
    %c0_62 = arith.constant 0 : index
    %c0_63 = arith.constant 0 : index
    %c0_64 = arith.constant 0 : index
    %148 = vector.load %arg13[%c0_62, %c0_63, %c0_64] : memref<1x128x32xf32, #tpu.memory_space<vmem>>, vector<1x128x32xf32>
    %149 = vector.shape_cast %148 : vector<1x128x32xf32> to vector<128x32xf32>
    %cst_65 = arith.constant dense<0.000000e+00> : vector<16x32xf32>
    %150 = tpu.matmul %147, %149, %cst_65 {dimension_numbers = #tpu.dot_dimension_numbers<[1], [0], [0], [1], [0, 0, 1, 1], [], []>} : vector<16x128xf32>, vector<128x32xf32>, vector<16x32xf32> -> vector<16x32xf32>
    %c0_66 = arith.constant 0 : index
    %c0_67 = arith.constant 0 : index
    %c0_68 = arith.constant 0 : index
    %151 = vector.load %arg14[%c0_66, %c0_67, %c0_68] : memref<1x1x32xf32, #tpu.memory_space<vmem>>, vector<1x1x32xf32>
    %152 = vector.shape_cast %151 : vector<1x1x32xf32> to vector<1x32xf32>
    %153 = vector.broadcast %152 : vector<1x32xf32> to vector<16x32xf32>
    %154 = arith.addf %150, %153 : vector<16x32xf32>
    %155 = arith.addf %106, %154 : vector<16x32xf32>
    %c0_69 = arith.constant 0 : index
    %c0_70 = arith.constant 0 : index
    %156 = vector.load %arg18[%c0_69, %c0_70] : memref<16x32xf32, #tpu.memory_space<vmem>>, vector<16x32xf32>
    tpu.vector_store %arg18[%c0_69, %c0_70], %155 {strides = array<i32>} : memref<16x32xf32, #tpu.memory_space<vmem>>, vector<16x32xf32>,
    %c2_i32 = arith.constant 2 : i32
    %157 = arith.cmpi eq, %arg1, %c2_i32 : i32
    %158 = arith.extui %157 : i1 to i32
    %c0_i32_71 = arith.constant 0 : i32
    %159 = arith.cmpi ne, %158, %c0_i32_71 : i32
    scf.if %159 {
      %c0_72 = arith.constant 0 : index
      %c0_73 = arith.constant 0 : index
      %160 = vector.load %arg15[%c0_72, %c0_73] : memref<1x32xf32, #tpu.memory_space<vmem>>, vector<1x32xf32>
      %c0_74 = arith.constant 0 : index
      %c0_75 = arith.constant 0 : index
      %161 = vector.load %arg16[%c0_74, %c0_75] : memref<1x32xf32, #tpu.memory_space<vmem>>, vector<1x32xf32>
      %cst_76 = arith.constant dense<0.000000e+00> : vector<16xf32>
      %162 = vector.multi_reduction <add>, %155, %cst_76 [1] : vector<16x32xf32> to vector<16xf32>
      %163 = vector.shape_cast %162 : vector<16xf32> to vector<16x1xf32>
      %cst_77 = arith.constant 3.200000e+01 : f32
      %164 = vector.broadcast %cst_77 : f32 to vector<16x1xf32>
      %165 = arith.divf %163, %164 : vector<16x1xf32>
      %166 = vector.broadcast %165 : vector<16x1xf32> to vector<16x32xf32>
      %167 = arith.subf %155, %166 : vector<16x32xf32>
      %168 = arith.mulf %167, %167 : vector<16x32xf32>
      %cst_78 = arith.constant dense<0.000000e+00> : vector<16xf32>
      %169 = vector.multi_reduction <add>, %168, %cst_78 [1] : vector<16x32xf32> to vector<16xf32>
      %170 = vector.shape_cast %169 : vector<16xf32> to vector<16x1xf32>
      %cst_79 = arith.constant 3.200000e+01 : f32
      %171 = vector.broadcast %cst_79 : f32 to vector<16x1xf32>
      %172 = arith.divf %170, %171 : vector<16x1xf32>
      %173 = vector.broadcast %165 : vector<16x1xf32> to vector<16x32xf32>
      %174 = arith.subf %155, %173 : vector<16x32xf32>
      %cst_80 = arith.constant 9.99999974E-6 : f32
      %175 = vector.broadcast %cst_80 : f32 to vector<16x1xf32>
      %176 = arith.addf %172, %175 : vector<16x1xf32>
      %177 = math.rsqrt %176 : vector<16x1xf32>
      %178 = vector.broadcast %177 : vector<16x1xf32> to vector<16x32xf32>
      %179 = arith.mulf %174, %178 : vector<16x32xf32>
      %180 = vector.broadcast %160 : vector<1x32xf32> to vector<16x32xf32>
      %181 = arith.mulf %179, %180 : vector<16x32xf32>
      %182 = vector.broadcast %161 : vector<1x32xf32> to vector<16x32xf32>
      %183 = arith.addf %181, %182 : vector<16x32xf32>
      %c0_81 = arith.constant 0 : index
      %c0_82 = arith.constant 0 : index
      %c0_83 = arith.constant 0 : index
      %184 = vector.load %arg17[%c0_81, %c0_82, %c0_83] : memref<1x16x32xf32, #tpu.memory_space<vmem>>, vector<1x16x32xf32>
      %185 = vector.shape_cast %184 : vector<1x16x32xf32> to vector<16x32xf32>
      %186 = vector.shape_cast %183 : vector<16x32xf32> to vector<1x16x32xf32>
      tpu.vector_store %arg17[%c0_81, %c0_82, %c0_83], %186 {strides = array<i32>} : memref<1x16x32xf32, #tpu.memory_space<vmem>>, vector<1x16x32xf32>,
    } else {
    }
    return
  }
  func.func @transform_0(%arg0: i32, %arg1: i32) -> (i32, i32, i32) {
    %c0_i32 = arith.constant 0 : i32
    %c0_i32_0 = arith.constant 0 : i32
    %c0_i32_1 = arith.constant 0 : i32
    return %arg0, %c0_i32, %c0_i32_0 : i32, i32, i32
  }
  func.func @transform_1(%arg0: i32, %arg1: i32) -> (i32, i32) {
    %c0_i32 = arith.constant 0 : i32
    %c0_i32_0 = arith.constant 0 : i32
    %c0_i32_1 = arith.constant 0 : i32
    return %c0_i32, %c0_i32_0 : i32, i32
  }
  func.func @transform_2(%arg0: i32, %arg1: i32) -> (i32, i32, i32) {
    %c0_i32 = arith.constant 0 : i32
    %c0_i32_0 = arith.constant 0 : i32
    %c0_i32_1 = arith.constant 0 : i32
    return %arg1, %c0_i32, %c0_i32_0 : i32, i32, i32
  }
  func.func @transform_3(%arg0: i32, %arg1: i32) -> (i32, i32, i32) {
    %c0_i32 = arith.constant 0 : i32
    %c0_i32_0 = arith.constant 0 : i32
    %c0_i32_1 = arith.constant 0 : i32
    return %arg1, %c0_i32, %c0_i32_0 : i32, i32, i32
  }
  func.func @transform_4(%arg0: i32, %arg1: i32) -> (i32, i32, i32) {
    %c0_i32 = arith.constant 0 : i32
    %c0_i32_0 = arith.constant 0 : i32
    %c0_i32_1 = arith.constant 0 : i32
    return %arg1, %c0_i32, %c0_i32_0 : i32, i32, i32
  }
  func.func @transform_5(%arg0: i32, %arg1: i32) -> (i32, i32, i32) {
    %c0_i32 = arith.constant 0 : i32
    %c0_i32_0 = arith.constant 0 : i32
    %c0_i32_1 = arith.constant 0 : i32
    return %arg1, %c0_i32, %c0_i32_0 : i32, i32, i32
  }
  func.func @transform_6(%arg0: i32, %arg1: i32) -> (i32, i32, i32) {
    %c0_i32 = arith.constant 0 : i32
    %c0_i32_0 = arith.constant 0 : i32
    %c0_i32_1 = arith.constant 0 : i32
    return %arg1, %c0_i32, %c0_i32_0 : i32, i32, i32
  }
  func.func @transform_7(%arg0: i32, %arg1: i32) -> (i32, i32, i32) {
    %c0_i32 = arith.constant 0 : i32
    %c0_i32_0 = arith.constant 0 : i32
    %c0_i32_1 = arith.constant 0 : i32
    return %arg1, %c0_i32, %c0_i32_0 : i32, i32, i32
  }
  func.func @transform_8(%arg0: i32, %arg1: i32) -> (i32, i32, i32) {
    %c0_i32 = arith.constant 0 : i32
    %c0_i32_0 = arith.constant 0 : i32
    %c0_i32_1 = arith.constant 0 : i32
    return %arg1, %c0_i32, %c0_i32_0 : i32, i32, i32
  }
  func.func @transform_9(%arg0: i32, %arg1: i32) -> (i32, i32, i32) {
    %c0_i32 = arith.constant 0 : i32
    %c0_i32_0 = arith.constant 0 : i32
    %c0_i32_1 = arith.constant 0 : i32
    return %arg1, %c0_i32, %c0_i32_0 : i32, i32, i32
  }
  func.func @transform_10(%arg0: i32, %arg1: i32) -> (i32, i32, i32) {
    %c0_i32 = arith.constant 0 : i32
    %c0_i32_0 = arith.constant 0 : i32
    %c0_i32_1 = arith.constant 0 : i32
    return %arg1, %c0_i32, %c0_i32_0 : i32, i32, i32
  }
  func.func @transform_11(%arg0: i32, %arg1: i32) -> (i32, i32, i32) {
    %c0_i32 = arith.constant 0 : i32
    %c0_i32_0 = arith.constant 0 : i32
    %c0_i32_1 = arith.constant 0 : i32
    return %arg1, %c0_i32, %c0_i32_0 : i32, i32, i32
  }
  func.func @transform_12(%arg0: i32, %arg1: i32) -> (i32, i32, i32) {
    %c0_i32 = arith.constant 0 : i32
    %c0_i32_0 = arith.constant 0 : i32
    %c0_i32_1 = arith.constant 0 : i32
    return %arg1, %c0_i32, %c0_i32_0 : i32, i32, i32
  }
  func.func @transform_13(%arg0: i32, %arg1: i32) -> (i32, i32) {
    %c0_i32 = arith.constant 0 : i32
    %c0_i32_0 = arith.constant 0 : i32
    %c0_i32_1 = arith.constant 0 : i32
    return %c0_i32, %c0_i32_0 : i32, i32
  }
  func.func @transform_14(%arg0: i32, %arg1: i32) -> (i32, i32) {
    %c0_i32 = arith.constant 0 : i32
    %c0_i32_0 = arith.constant 0 : i32
    %c0_i32_1 = arith.constant 0 : i32
    return %c0_i32, %c0_i32_0 : i32, i32
  }
  func.func @transform_15(%arg0: i32, %arg1: i32) -> (i32, i32, i32) {
    %c0_i32 = arith.constant 0 : i32
    %c0_i32_0 = arith.constant 0 : i32
    %c0_i32_1 = arith.constant 0 : i32
    return %arg0, %c0_i32, %c0_i32_0 : i32, i32, i32
  }
}

</mosaic_0001>

<bundles_post_ra>
// kernel: tpu_custom_call.1
= control target key start
LH: loop header
LB: loop body
LE: loop exit
PB: predicated region body
PF: predicated region fallthrough
CT: control target
= control target key end

     0   :  { %s3382_s0 = inlined_call_operand.vmem [shape: f32[2,16,32], index: 0, kind: input, shape index: {}]   ;;  %s3383_s1 = inlined_call_operand.vmem [shape: f32[16,16], index: 1, kind: input, shape index: {}]   ;;  %s3384_s2 = inlined_call_operand.vmem [shape: f32[3,1,32], index: 2, kind: input, shape index: {}]   ;;  %s3385_s3 = inlined_call_operand.vmem [shape: f32[3,1,32], index: 3, kind: input, shape index: {}]   ;;  %s3386_s4 = inlined_call_operand.vmem [shape: f32[3,32,96], index: 4, kind: input, shape index: {}]   ;;  %s3387_s5 = inlined_call_operand.vmem [shape: f32[3,32,32], index: 5, kind: input, shape index: {}]   ;;  %s3388_s6 = inlined_call_operand.vmem [shape: f32[3,1,32], index: 6, kind: input, shape index: {}]   ;;  %s3389_s7 = inlined_call_operand.vmem [shape: f32[3,1,32], index: 7, kind: input, shape index: {}]   ;;  %s3390_s8 = inlined_call_operand.vmem [shape: f32[3,1,32], index: 8, kind: input, shape index: {}]   ;;  %s3391_s9 = inlined_call_operand.vmem [shape: f32[3,32,128], index: 9, kind: input, shape index: {}]   ;;  %s3392_s10 = inlined_call_operand.vmem [shape: f32[3,1,128], index: 10, kind: input, shape index: {}]   ;;  %s3393_s11 = inlined_call_operand.vmem [shape: f32[3,128,32], index: 11, kind: input, shape index: {}]   ;;  %s3394_s12 = inlined_call_operand.vmem [shape: f32[3,1,32], index: 12, kind: input, shape index: {}]   ;;  %s3395_s13 = inlined_call_operand.vmem [shape: f32[1,32], index: 13, kind: input, shape index: {}]   ;;  %s3396_s14 = inlined_call_operand.vmem [shape: f32[1,32], index: 14, kind: input, shape index: {}]   ;;  %s3397_s15 = inlined_call_operand.hbm [shape: f32[2,16,32], index: 15, kind: output, shape index: {}]  }
   0x1   :  { %3414 = sst [smem:[#allocation19_spill]] %s3382_s0 }
   0x2   :  { %3415 = sst [smem:[#allocation20_spill]] %s3383_s1 }
   0x3   :  { %3416 = sst [smem:[#allocation21_spill]] %s3386_s4 }
   0x4   :  { %3417 = sst [smem:[#allocation22_spill]] %s3387_s5 }
   0x5   :  { %3418 = sst [smem:[#allocation23_spill]] %s3395_s13 }
   0x6   :  { %3419 = sst [smem:[#allocation24_spill]] %s3396_s14 }
   0x7   :  { %3420 = sst [smem:[#allocation25_spill]] %s3397_s15 }
   0x8   :  { %20 = vsyncpa [#allocation4], 0 }
   0x9   :  { %22 = vsyncpa [#allocation4 + $0x1], 0  ;;  %s2970_s18 = smov 0   ;;  %s2972_s19 = smov 0  }
   0xa   :  { %s2974_s20 = smov 0   ;;  %s2976_s21 = smov 0  }
   0xb   :  { %s2978_s22 = smov 0   ;;  %s2980_s23 = smov 0  }
   0xc   :  { %s2982_s24 = smov 0   ;;  %s2984_s25 = smov 0  }
   0xd LB: > { %3421 = sst [smem:[#allocation6_spill]] %s2844_s18  ;;  %s2248_s26 = sadd.s32 4294967295, %s2872_s25   ;;  %s2872_s25 = sphi %s2984_s25, %s28_s25   ;;  %s2868_s24 = sphi %s2982_s24, %s3465_s24   ;;  %s2864_s23 = sphi %s2980_s23, %s3464_s23   ;;  %s2860_s22 = sphi %s2978_s22, %s3463_s22   ;;  %s2856_s21 = sphi %s2976_s21, %s3462_s21   ;;  %s2852_s20 = sphi %s2974_s20, %s3461_s20   ;;  %s2848_s19 = sphi %s2972_s19, %s3460_s19   ;;  %s2844_s18 = sphi %s2970_s18, %s3459_s18  }
   0xe   : > { %3422 = sst [smem:[#allocation7_spill]] %s2848_s19  ;;  %s2249_s27 = sadd.s32 4294967294, %s2872_s25  }
   0xf   : > { %3423 = sst [smem:[#allocation8_spill]] %s2852_s20  ;;  %s37_s28 = sadd.s32 1, %s2864_s23 }
  0x10   : > { %3424 = sst [smem:[#allocation9_spill]] %s2856_s21  ;;  %p38_p0 = scmp.ge.s32.totalorder %s37_s28, 3 }
  0x11   : > { %3425 = sst [smem:[#allocation10_spill]] %s2860_s22  ;;  %s40_s29 = sadd.s32 1, %s2868_s24 }
  0x12   : > { %3426 = sst [smem:[#allocation11_spill]] %s2864_s23  ;;  %p432_p1 = scmp.ne.s32.totalorder %s2852_s20, %s2848_s19 }
  0x13   : > { %3427 = sst [smem:[#allocation12_spill]] %s2868_s24  ;;  %p433_p2 = scmp.eq.s32.totalorder %s2248_s26, 5 }
  0x14   : > { %3428 = sst [smem:[#allocation13_spill]] %s2872_s25  ;;  %s3467_s28 = smov (%p38_p0, %s37_s28), 0 }
  0x15   : > { %3429 = sst [smem:[#allocation14_spill]] %s3467_s28  ;;  %s3469_s29 = smov (!%p38_p0, %s40_s29), %s2868_s24 }
  0x16   : > { %p3019_p3 = por %p433_p2, %p432_p1  ;;  %p438_p4 = scmp.ne.s32.totalorder %s2848_s19, %s2844_s18 }
  0x17   : > { %p42_p5 = scmp.ge.s32.totalorder %s3469_s29, 2  ;;  %p439_p6 = scmp.eq.s32.totalorder %s2249_s27, 5 }
  0x18   : > { %s3430_s30 = scalar_select %p3019_p3, 1, 0 }
  0x19   : > { %p2252_p7 = scmp.ge.s32.totalorder %s2872_s25, 1  ;;  %p548_p8 = scmp.lt.s32.totalorder %s2872_s25, 7 }
  0x1a   : > { %3431 = sst [smem:[#allocation15_spill]] %s3430_s30  ;;  %s3471_s29 = smov (%p42_p5, %s3469_s29), 0 }
  0x1b   : > { %3432 = sst [smem:[#allocation16_spill]] %s3471_s29  ;;  %p3029_p9 = por %p439_p6, %p438_p4 }
  0x1c   : > { %p549_p10 = pnand %p2252_p7, %p548_p8  ;;  %s419_s17 = ssub.s32 %s2868_s24, %s3471_s29 }
  0x1d   : > { %s3433_s16 = scalar_select %p3029_p9, 1, 0 }
  0x1e   : > { %s422_s26 = sadd.s32 1, %s2852_s20  ;;  %p420_p11 = scmp.eq.s32.totalorder %s419_s17, 0 }
  0x1f   : > { %3434 = sst [smem:[#allocation17_spill]] %s3433_s16  ;;  %552 = sbr.rel (%p549_p10) target bundleno = 3469 (0xd8d), region = 80 }
  0x20   : > { %s3037_s28 = scalar_select %p420_p11, %s2852_s20, %s422_s26  }
  0x21   : > { %s3403_s27 = sand.u32 (!%p549_p10), 1, %s2848_s19   ;;  %p637_p12 = scmp.lt.s32.totalorder (!%p549_p10), %s2860_s22, 1 }
  0x22   : > { %3435 = sst [smem:[#allocation18_spill]] %s3037_s28  ;;  %s2253_s23 = sshll.u32 (!%p549_p10), %s3403_s27, 4 }
  0x23   : > { %p642_p13 = scmp.lt.s32.totalorder (!%p549_p10), %s2856_s21, 2  ;;  %s3436_s0 = sld [smem:[#allocation19_spill]] (!%p549_p10) }
  0x24   : > { %s3437_s4 = sld [smem:[#allocation21_spill]] (!%p549_p10)  ;;  %s3438_s5 = sld [smem:[#allocation22_spill]] (!%p549_p10) }
  0x25   : > { %s3101_s25 = scalar_lea.vmem (!%p549_p10), [#allocation3], %s2253_s23  ;;  %s3439_s20 = sld [smem:[#allocation9_spill]] (!%p549_p10) }
  0x26   : > { %s638_s18 = scalar_select %p637_p12, %s2860_s22, 1 }
  0x27   : > { %s3046_s16 = scalar_select %p642_p13, %s2856_s21, 2 }
  0x28   : > { %s2310_s17 = sshll.u32 %s638_s18, 4 }
  0x29   : > { %s641_s24 = scalar_lea.vmem %s3436_s0, %s2310_s17  ;;  %s2311_s19 = sshll.u32 %s3046_s16, 5 }
  0x2a   : > { %s3063_s13 = scalar_lea.vmem %s3437_s4, %s2311_s19  ;;  %s3068_s21 = scalar_lea.vmem %s3438_s5, %s2311_s19 }
  0x2b   : > { %s663_s15 = scalar_lea.vmem %s3389_s7, %s3046_s16  ;;  %s3085_s0 = scalar_lea.vmem %s3391_s9, %s2311_s19 }
  0x2c   : > { %s674_s4 = scalar_lea.vmem %s3392_s10, %s3046_s16  ;;  %s2314_s5 = sshll.u32 %s3046_s16, 7 }
  0x2d   : > { %s3095_s28 = scalar_lea.vmem %s3393_s11, %s2314_s5  ;;  %s682_s30 = scalar_lea.vmem %s3394_s12, %s3046_s16 }
  0x2e   : > { %p2264_p0 = scmp.ne.s32.totalorder %s3439_s20, 0 }
  0x2f   : > { %v687_v0 = vld [vmem:[%s641_s24] sm:$0xff] (!%p2264_p0)  ;;  %vm689_vm0 = vcmask (!%p2264_p0), 261120   ;;  %v688_v1 = vld [vmem:[%s641_s24 + $0x8] sm:$0xff] (!%p2264_p0) }
  0x30   : > { %686 = sbr.rel (%p2264_p0) target bundleno = 55 (0x37), region = 84  ;;  %690 = vst.msk [vmem:[#allocation2] sm:$0xff] (!%p2264_p0), %vm689_vm0, %v687_v0  ;;  %691 = vst.msk [vmem:[#allocation2 + $0x8] sm:$0xff] (!%p2264_p0), %vm689_vm0, %v688_v1 }
  0x37 PF: > { %v3104_v2 = vld [vmem:[#allocation2] sm:$0xff]  ;;  %vm696_vm1 = vcmask 261120   ;;  %v3106_v3 = vld [vmem:[#allocation2 + $0x8] sm:$0xff]  ;;  %v742_v18 = vld [vmem:[%s3063_s13 + $0x10] sm:$0xff]  ;;  %s3440_s20 = scalar_lea.vmem %s3384_s2, %s3046_s16  ;;  %s3441_s24 = scalar_lea.vmem %s3385_s3, %s3046_s16  ;;  %vm833_vm2 = vcmask 64512   ;;  %vm917_vm4 = vcmask 130048  }
  0x38   : > { %v697_v4 = vsel %vm696_vm1, %v3104_v2, 0.0  ;;  %v700_v5 = vsel %vm696_vm1, %v3106_v3, 0.0  ;;  %v740_v16 = vld [vmem:[%s3063_s13] sm:$0xff]  ;;  %v741_v17 = vld [vmem:[%s3063_s13 + $0x8] sm:$0xff]  ;;  %v743_v20 = vld [vmem:[%s3063_s13 + $0x18] sm:$0xff]  ;;  %s2874_s14 = smov 88   ;;  %s3445_s27 = scalar_lea.vmem %s3388_s6, %s3046_s16 }
  0x39   : > { %698 = vadd.xlane.f32.xlu0 %v697_v4  ;;  %v2508_v19 = vpack.c.bf16 %v741_v17, %v740_v16  ;;  %v2512_v21 = vpack.c.bf16 %v743_v20, %v742_v18  ;;  %v2265_v29 = vld [vmem:[%s3440_s20] ss:$0 sm:$0xff]  ;;  %s2875_s22 = smov 96   ;;  %s2876_s1 = smov 80   ;;  %vm3140_vm3 = vmpackc.low %vm833_vm2, %vm833_vm2  ;;  %vm1655_vm5 = vcmask 195584  }
  0x3a   : > { %v2266_v31 = vld [vmem:[%s3441_s24] ss:$0 sm:$0xff]  ;;  %s2877_s18 = smov 120   ;;  %s2878_s29 = smov 112  }
  0x3b   : > { %2509 = vmatprep.subr.bf16.mxu1 %v2508_v19  ;;  %s3444_s26 = sld [smem:[#allocation20_spill]]  ;;  %s2879_s20 = smov 48  }
  0x3c   : > { %2511 = vmatpush3.bf16.msra.mxu1 %v2508_v19  ;;  %s2880_s13 = smov 104   ;;  %s2881_s23 = smov 72  }
  0x3d   : > { %701 = vadd.xlane.f32.xlu0 %v700_v5  ;;  %2513 = vmatprep.subr.bf16.mxu1 %v2512_v21  ;;  %s2882_s24 = smov 64  }
  0x40   : > { %2515 = vmatpush3.bf16.msra.mxu1 %v2512_v21 }
  0x41   : > { %v3164_v62 = vld [vmem:[%s3444_s26 + $0x8] sm:$0xff]  ;;  %v3169_v0 = vld [vmem:[%s3444_s26] sm:$0xff] }
  0xc6   : > { %v699_v6 = vpop.xlane.xlu0 %698 }
  0xc7   : > { %v704_v7 = vmul.f32 0.03125, %v699_v6 }
  0xc9   : > { %v706_v8 = vsub.f32 %v3104_v2, %v704_v7 }
  0xca   : > { %v702_v9 = vpop.xlane.xlu0 %701 }
  0xcb   : > { %v705_v10 = vmul.f32 0.03125, %v702_v9  ;;  %v708_v11 = vmul.f32 %v706_v8, %v706_v8 }
  0xcd   : > { %v707_v12 = vsub.f32 %v3106_v3, %v705_v10  ;;  %v710_v13 = vsel %vm696_vm1, %v708_v11, 0.0 }
  0xce   : > { %711 = vadd.xlane.f32.xlu1 %v710_v13 }
  0xcf   : > { %v709_v14 = vmul.f32 %v707_v12, %v707_v12 }
  0xd1   : > { %v713_v15 = vsel %vm696_vm1, %v709_v14, 0.0 }
  0xd2   : > { %714 = vadd.xlane.f32.xlu1 %v713_v15 }
 0x15b   : > { %v712_v22 = vpop.xlane.xlu1 %711 }
 0x15c   : > { %v716_v23 = vmul.f32 0.03125, %v712_v22 }
 0x15e   : > { %v718_v24 = vadd.f32 1e-05, %v716_v23 }
 0x15f   : > { %v715_v25 = vpop.xlane.xlu1 %714 }
 0x160   : > { %2730 = vrsqrt.f32 %v718_v24  ;;  %v717_v26 = vmul.f32 0.03125, %v715_v25 }
 0x162   : > { %v719_v27 = vadd.f32 1e-05, %v717_v26 }
 0x164   : > { %2732 = vrsqrt.f32 %v719_v27 }
 0x16a   : > { %v2731_v28 = vpop.eup %2730 }
 0x16b   : > { %v722_v30 = vmul.f32 %v2731_v28, %v706_v8 }
 0x16d   : > { %v730_v32 = vmul.f32 %v2265_v29, %v722_v30 }
 0x16e   : > { %v2733_v33 = vpop.eup %2732 }
 0x16f   : > { %v723_v34 = vmul.f32 %v2733_v33, %v707_v12  ;;  %v738_v35 = vadd.f32 %v2266_v31, %v730_v32 }
 0x171   : > { %v731_v36 = vmul.f32 %v2265_v29, %v723_v34  ;;  %2392 = vmatprep.mubr.msk.f32.mxu1 %vm696_vm1, %v738_v35 }
 0x173   : > { %v739_v37 = vadd.f32 %v2266_v31, %v731_v36 }
 0x175   : > { %2393 = vmatmul.mubr.msk.f32.vlgmr.msra.gmra.mrb[0].mxu1 %vm696_vm1, %v739_v37 }
 0x248   : > { %v2394_v38 = vpop.f32.mrb[0].mxu1 }
 0x249   : > { %v816_v39 = vpop.f32.mrb[1].mxu1 }
 0x24a   : > { %2399 = vmatprep.mubr.msk.f32.mxu1 %vm833_vm2, %v816_v39  ;;  %v3133_v40 = vpack.i.bf16 %v2394_v38, %v816_v39 }
 0x24c   : > { %2696 = vrot.lane.b32.xlu1 %v3133_v40, %s2874_s14  ;;  %2691 = vrot.lane.b32.xlu0 %v3133_v40, %s2875_s22  ;;  %s2883_s14 = smov 40   ;;  %s2884_s22 = smov 56  }
 0x250   : > { %2701 = vrot.lane.b32.xlu1 %v3133_v40, %s2876_s1  ;;  %1029 = vrot.lane.b32.xlu0 %v2394_v38, %s2877_s18  ;;  %s2885_s1 = smov 16  }
 0x254   : > { %1027 = vrot.lane.b32.xlu1 %v816_v39, %s2877_s18  ;;  %1229 = vrot.lane.b32.xlu0 %v2394_v38, %s2878_s29  ;;  %s2886_s18 = smov 8  }
 0x258   : > { %1227 = vrot.lane.b32.xlu1 %v816_v39, %s2878_s29  ;;  %s2887_s29 = smov 24  }
 0x2be   : > { %v2697_v41 = vpop.permute.xlu1 %2696  ;;  %v2692_v42 = vpop.permute.xlu0 %2691 }
 0x2bf   : > { %v2699_v43 = vunpack.i.h.bf16 %v2697_v41  ;;  %v2698_v44 = vunpack.i.l.bf16 %v2697_v41  ;;  %v2694_v45 = vunpack.i.h.bf16 %v2692_v42  ;;  %v2693_v46 = vunpack.i.l.bf16 %v2692_v42 }
 0x2c1   : > { %v2516_v48 = vpack.c.bf16 %v2694_v45, %v2693_v46  ;;  %v2526_v49 = vpack.c.bf16 %v2699_v43, %v2698_v44 }
 0x2c2   : > { %v2702_v50 = vpop.permute.xlu1 %2701  ;;  %v1030_v55 = vpop.permute.xlu0 %1029 }
 0x2c3   : > { %2518 = vmatprep.subr.msk.bf16.mxu1 %vm3140_vm3, %v2516_v48  ;;  %v2704_v51 = vunpack.i.h.bf16 %v2702_v50  ;;  %v2703_v52 = vunpack.i.l.bf16 %v2702_v50 }
 0x2c4   : > { %2521 = vmatpush3.bf16.xpose.msk.msra.mxu1 %vm3140_vm3, %v2516_v48 }
 0x2c5   : > { %2528 = vmatprep.subr.msk.bf16.mxu1 %vm3140_vm3, %v2526_v49  ;;  %v2536_v53 = vpack.c.bf16 %v2704_v51, %v2703_v52 }
 0x2c6   : > { %v1028_v54 = vpop.permute.xlu1 %1027  ;;  %v1230_v57 = vpop.permute.xlu0 %1229 }
 0x2ca   : > { %v1228_v56 = vpop.permute.xlu1 %1227 }
 0x2cb   : > { %2400 = vmatmul.mubr.msk.f32.vlgmr.msra.gmra.mrb[2].mxu1 %vm833_vm2, %v2394_v38 }
 0x2cc   : > { %2531 = vmatpush3.bf16.xpose.msk.msra.mxu1 %vm3140_vm3, %v2526_v49  ;;  %2413 = vmatprep.mubr.msk.f32.mxu1 %vm833_vm2, %v1028_v54 }
 0x2cd   : > { %2538 = vmatprep.subr.msk.bf16.mxu1 %vm3140_vm3, %v2536_v53 }
 0x2d3   : > { %2414 = vmatmul.mubr.msk.f32.vlgmr.msra.gmra.mrb[4].mxu1 %vm833_vm2, %v1030_v55 }
 0x2d4   : > { %2541 = vmatpush3.bf16.xpose.msk.msra.mxu1 %vm3140_vm3, %v2536_v53  ;;  %2427 = vmatprep.mubr.msk.f32.mxu1 %vm833_vm2, %v1228_v56 }
 0x2db   : > { %2428 = vmatmul.mubr.msk.f32.vlgmr.msra.gmra.mrb[6].mxu1 %vm833_vm2, %v1230_v57 }
 0x39e   : > { %v2401_v58 = vpop.f32.mrb[2].mxu1 }
 0x39f   : > { %v908_v59 = vpop.f32.mrb[3].mxu1  ;;  %v914_v24 = vadd.f32 %v2401_v58, %v3164_v62 }
 0x3a0   : > { %v909_v8 = vadd.f32 %v908_v59, %v3169_v0 }
 0x3a1   : > { %v921_v26 = vsel %vm917_vm4, %v914_v24, -inf }
 0x3a2   : > { %v918_v9 = vsel %vm917_vm4, %v909_v8, -inf }
 0x3a6   : > { %v2415_v60 = vpop.f32.mrb[4].mxu1 }
 0x3a7   : > { %v1109_v61 = vpop.f32.mrb[5].mxu1  ;;  %v1115_v27 = vadd.f32 %v2415_v60, %v3164_v62 }
 0x3a8   : > { %v1110_v25 = vadd.f32 %v1109_v61, %v3169_v0 }
 0x3a9   : > { %v1121_v29 = vsel %vm917_vm4, %v1115_v27, -inf }
 0x3aa   : > { %v1118_v28 = vsel %vm917_vm4, %v1110_v25, -inf }
 0x3ae   : > { %v2429_v63 = vpop.f32.mrb[6].mxu1 }
 0x3af   : > { %v1315_v1 = vadd.f32 %v2429_v63, %v3164_v62  ;;  %v1309_v4 = vpop.f32.mrb[7].mxu1 }
 0x3b0   : > { %v1310_v5 = vadd.f32 %v1309_v4, %v3169_v0 }
 0x3b1   : > { %v1321_v6 = vsel %vm917_vm4, %v1315_v1, -inf }
 0x3b2   : > { %1322 = vmax.xlane.f32.xlu0 %v1321_v6  ;;  %v1318_v7 = vsel %vm917_vm4, %v1310_v5, -inf }
 0x3b3   : > { %1319 = vmax.xlane.f32.xlu1 %v1318_v7 }
 0x3c4   : > { %2706 = vrot.lane.b32.xlu1 %v3133_v40, %s2879_s20 }
 0x3c8   : > { %1427 = vrot.lane.b32.xlu1 %v816_v39, %s2880_s13 }
 0x3cc   : > { %1429 = vrot.lane.b32.xlu1 %v2394_v38, %s2880_s13  ;;  %s3446_s13 = scalar_lea.vmem %s3390_s8, %s3046_s16 }
 0x3f0   : > { %919 = vmax.xlane.f32.xlu1 %v918_v9 }
 0x43f   : > { %v1323_v10 = vpop.xlane.xlu0 %1322 }
 0x440   : > { %v1325_v11 = vsub.f32 %v1315_v1, %v1323_v10  ;;  %v1320_v12 = vpop.xlane.xlu1 %1319 }
 0x441   : > { %v1324_v13 = vsub.f32 %v1310_v5, %v1320_v12 }
 0x442   : > { %v1328_v14 = vmul.f32 1.442695, %v1325_v11 }
 0x443   : > { %v1326_v15 = vmul.f32 1.442695, %v1324_v13 }
 0x444   : > { %2734 = vpow2.f32 %v1328_v14  ;;  %v2707_v16 = vpop.permute.xlu1 %2706 }
 0x445   : > { %v2709_v17 = vunpack.i.h.bf16 %v2707_v16  ;;  %v2708_v18 = vunpack.i.l.bf16 %v2707_v16  ;;  %2736 = vpow2.f32 %v1326_v15 }
 0x447   : > { %v2542_v19 = vpack.c.bf16 %v2709_v17, %v2708_v18 }
 0x448   : > { %v1428_v41 = vpop.permute.xlu1 %1427 }
 0x449   : > { %2543 = vmatprep.subr.bf16.mxu1 %v2542_v19 }
 0x44a   : > { %2545 = vmatpush3.bf16.msra.mxu1 %v2542_v19 }
 0x44c   : > { %v1430_v42 = vpop.permute.xlu1 %1429 }
 0x44e   : > { %v2735_v20 = vpop.eup %2734 }
 0x44f   : > { %v1333_v21 = vsel %vm917_vm4, %v2735_v20, 0.0  ;;  %v2737_v22 = vpop.eup %2736 }
 0x450   : > { %1334 = vadd.xlane.f32.xlu0 %v1333_v21  ;;  %v1330_v23 = vsel %vm917_vm4, %v2737_v22, 0.0 }
 0x454   : > { %1331 = vadd.xlane.f32.xlu0 %v1330_v23 }
 0x46a   : > { %2711 = vrot.lane.b32.xlu0 %v3133_v40, %s2881_s23 }
 0x47d   : > { %v920_v45 = vpop.xlane.xlu1 %919 }
 0x47e   : > { %v924_v48 = vsub.f32 %v909_v8, %v920_v45 }
 0x480   : > { %v926_v52 = vmul.f32 1.442695, %v924_v48 }
 0x489   : > { %922 = vmax.xlane.f32.xlu0 %v921_v26 }
 0x48d   : > { %1119 = vmax.xlane.f32.xlu0 %v1118_v28 }
 0x491   : > { %1122 = vmax.xlane.f32.xlu0 %v1121_v29 }
 0x4dd   : > { %v1335_v30 = vpop.xlane.xlu0 %1334 }
 0x4de   : > { %2738 = vrcp.f32 %v1335_v30 }
 0x4e1   : > { %v1332_v31 = vpop.xlane.xlu0 %1331 }
 0x4e2   : > { %2740 = vrcp.f32 %v1332_v31 }
 0x4e5   : > { %v2712_v32 = vpop.permute.xlu0 %2711 }
 0x4e6   : > { %v2714_v33 = vunpack.i.h.bf16 %v2712_v32  ;;  %v2713_v34 = vunpack.i.l.bf16 %v2712_v32 }
 0x4e8   : > { %v2546_v35 = vpack.c.bf16 %v2714_v33, %v2713_v34  ;;  %v2739_v36 = vpop.eup %2738 }
 0x4e9   : > { %v1339_v39 = vmul.f32 %v2739_v36, %v2735_v20 }
 0x4ea   : > { %2548 = vmatprep.subr.msk.bf16.mxu1 %vm3140_vm3, %v2546_v35 }
 0x4ec   : > { %v2741_v37 = vpop.eup %2740 }
 0x4ed   : > { %v1338_v38 = vmul.f32 %v2741_v37, %v2737_v22 }
 0x4ef   : > { %2434 = vmatprep.mubr.msk.f32.mxu1 %vm917_vm4, %v1338_v38 }
 0x4f0   : > { %2435 = vmatmul.mubr.msk.f32.vlgmr.msra.gmra.mrb[8].mxu1 %vm917_vm4, %v1339_v39 }
 0x4f1   : > { %2551 = vmatpush3.bf16.xpose.msk.msra.mxu1 %vm3140_vm3, %v2546_v35  ;;  %2441 = vmatprep.mubr.msk.f32.mxu1 %vm833_vm2, %v1428_v41 }
 0x4f8   : > { %2442 = vmatmul.mubr.msk.f32.vlgmr.msra.gmra.mrb[10].mxu1 %vm833_vm2, %v1430_v42 }
 0x516   : > { %v923_v43 = vpop.xlane.xlu0 %922 }
 0x517   : > { %v925_v46 = vsub.f32 %v914_v24, %v923_v43 }
 0x519   : > { %v928_v50 = vmul.f32 1.442695, %v925_v46 }
 0x51a   : > { %v1120_v44 = vpop.xlane.xlu0 %1119 }
 0x51b   : > { %v1124_v53 = vsub.f32 %v1110_v25, %v1120_v44  ;;  %2742 = vpow2.f32 %v928_v50 }
 0x51c   : > { %2744 = vpow2.f32 %v926_v52  ;;  %v1658_v52 = vld [vmem:[%s3068_s21] sm:$0xff] }
 0x51d   : > { %v1126_v56 = vmul.f32 1.442695, %v1124_v53  ;;  %v1659_v53 = vld [vmem:[%s3068_s21 + $0x8] sm:$0xff] }
 0x51e   : > { %v1123_v49 = vpop.xlane.xlu0 %1122 }
 0x51f   : > { %v1125_v51 = vsub.f32 %v1115_v27, %v1123_v49 }
 0x521   : > { %v1128_v47 = vmul.f32 1.442695, %v1125_v51 }
 0x523   : > { %2746 = vpow2.f32 %v1128_v47  ;;  %v1660_v47 = vld [vmem:[%s3068_s21 + $0x10] sm:$0xff] }
 0x524   : > { %2748 = vpow2.f32 %v1126_v56  ;;  %v1661_v56 = vld [vmem:[%s3068_s21 + $0x18] sm:$0xff] }
 0x525   : > { %v2743_v63 = vpop.eup %2742 }
 0x526   : > { %v2745_v4 = vpop.eup %2744  ;;  %v933_v5 = vsel %vm917_vm4, %v2743_v63, 0.0 }
 0x527   : > { %v930_v7 = vsel %vm917_vm4, %v2745_v4, 0.0 }
 0x52d   : > { %v3204_v6 = vpop.eup %2746 }
 0x52e   : > { %v2749_v8 = vpop.eup %2748 }
 0x5c3   : > { %v3195_v54 = vpop.f32.mrb[8].mxu1 }
 0x5c4   : > { %v3197_v55 = vpop.f32.mrb[9].mxu1 }
 0x5cb   : > { %v2443_v57 = vpop.f32.mrb[10].mxu1 }
 0x5cc   : > { %v1515_v58 = vadd.f32 %v2443_v57, %v3164_v62  ;;  %v1509_v59 = vpop.f32.mrb[11].mxu1  ;;  %v1133_v62 = vsel %vm917_vm4, %v3204_v6, 0.0  ;;  %v2560_v57 = vpack.c.bf16 %v1661_v56, %v1660_v47 }
 0x5cd   : > { %v1510_v60 = vadd.f32 %v1509_v59, %v3169_v0  ;;  %v1130_v0 = vsel %vm917_vm4, %v2749_v8, 0.0 }
 0x5ce   : > { %v1521_v61 = vsel %vm917_vm4, %v1515_v58, -inf }
 0x5cf   : > { %1522 = vmax.xlane.f32.xlu0 %v1521_v61  ;;  %v1518_v1 = vsel %vm917_vm4, %v1510_v60, -inf }
 0x5d0   : > { %1519 = vmax.xlane.f32.xlu1 %v1518_v1 }
 0x5d3   : > { %934 = vadd.xlane.f32.xlu0 %v933_v5 }
 0x5d4   : > { %931 = vadd.xlane.f32.xlu1 %v930_v7 }
 0x5d7   : > { %1134 = vadd.xlane.f32.xlu0 %v1133_v62 }
 0x5d8   : > { %1131 = vadd.xlane.f32.xlu1 %v1130_v0 }
 0x5e9   : > { %2716 = vrot.lane.b32.xlu1 %v3133_v40, %s2882_s24  ;;  %s3447_s24 = sld [smem:[#allocation9_spill]] }
 0x5ef   : > { %p2302_p1 = scmp.ne.s32.totalorder %s3447_s24, 2 }
 0x65c   : > { %v1523_v9 = vpop.xlane.xlu0 %1522 }
 0x65d   : > { %v1525_v10 = vsub.f32 %v1515_v58, %v1523_v9  ;;  %v1520_v11 = vpop.xlane.xlu1 %1519 }
 0x65e   : > { %v1524_v12 = vsub.f32 %v1510_v60, %v1520_v11  ;;  %v2293_v11 = vld [vmem:[%s3445_s27] ss:$0 sm:$0xff] }
 0x65f   : > { %v1528_v13 = vmul.f32 1.442695, %v1525_v10 }
 0x660   : > { %v1526_v14 = vmul.f32 1.442695, %v1524_v12  ;;  %v935_v15 = vpop.xlane.xlu0 %934 }
 0x661   : > { %2750 = vpow2.f32 %v1528_v13  ;;  %v932_v16 = vpop.xlane.xlu1 %931 }
 0x662   : > { %2752 = vpow2.f32 %v1526_v14 }
 0x663   : > { %2754 = vrcp.f32 %v935_v15 }
 0x664   : > { %2756 = vrcp.f32 %v932_v16  ;;  %v1135_v32 = vpop.xlane.xlu0 %1134 }
 0x665   : > { %v1132_v17 = vpop.xlane.xlu1 %1131 }
 0x666   : > { %2758 = vrcp.f32 %v1132_v17 }
 0x667   : > { %2760 = vrcp.f32 %v1135_v32  ;;  %v1799_v32 = vld [vmem:[%s3085_s0 + $0x18] sm:$0xff] }
 0x669   : > { %v2717_v18 = vpop.permute.xlu1 %2716 }
 0x66a   : > { %v2719_v19 = vunpack.i.h.bf16 %v2717_v18  ;;  %v2718_v20 = vunpack.i.l.bf16 %v2717_v18 }
 0x66b   : > { %v2751_v21 = vpop.eup %2750 }
 0x66c   : > { %v2753_v22 = vpop.eup %2752  ;;  %v1533_v23 = vsel %vm917_vm4, %v2751_v21, 0.0  ;;  %v2522_v24 = vpack.c.bf16 %v2719_v19, %v2718_v20 }
 0x66d   : > { %v2755_v25 = vpop.eup %2754  ;;  %1534 = vadd.xlane.f32.xlu0 %v1533_v23  ;;  %v1530_v26 = vsel %vm917_vm4, %v2753_v22, 0.0 }
 0x66e   : > { %v2757_v27 = vpop.eup %2756  ;;  %1531 = vadd.xlane.f32.xlu1 %v1530_v26  ;;  %2523 = vmatprep.subr.bf16.mxu0 %v2522_v24  ;;  %v939_v30 = vmul.f32 %v2755_v25, %v2743_v63 }
 0x66f   : > { %2525 = vmatpush3.bf16.msra.mxu0 %v2522_v24  ;;  %v938_v28 = vmul.f32 %v2757_v27, %v2745_v4 }
 0x670   : > { %v2759_v29 = vpop.eup %2758 }
 0x671   : > { %2406 = vmatprep.mubr.msk.f32.mxu0 %vm917_vm4, %v938_v28  ;;  %v1138_v31 = vmul.f32 %v2759_v29, %v2749_v8  ;;  %v2761_v43 = vpop.eup %2760  ;;  %v1796_v28 = vld [vmem:[%s3085_s0] sm:$0xff]  ;;  %v1797_v29 = vld [vmem:[%s3085_s0 + $0x8] sm:$0xff] }
 0x672   : > { %2407 = vmatmul.mubr.msk.f32.vlgmr.msra.gmra.mrb[0].mxu0 %vm917_vm4, %v939_v30  ;;  %v1139_v45 = vmul.f32 %v2761_v43, %v3204_v6  ;;  %v2564_v30 = vpack.c.bf16 %v1797_v29, %v1796_v28 }
 0x673   : > { %2420 = vmatprep.mubr.msk.f32.mxu0 %vm917_vm4, %v1138_v31  ;;  %v1798_v31 = vld [vmem:[%s3085_s0 + $0x10] sm:$0xff] }
 0x674   : > { %2565 = vmatprep.subr.bf16.mxu1 %v2564_v30 }
 0x675   : > { %2567 = vmatpush3.bf16.msra.mxu1 %v2564_v30 }
 0x67f   : > { %2726 = vrot.lane.b32.xlu1 %v3133_v40, %s2883_s14  ;;  %s3448_s14 = sld [smem:[#allocation23_spill]] (!%p2302_p1) }
 0x683   : > { %2721 = vrot.lane.b32.xlu0 %v3133_v40, %s2884_s22 }
 0x687   : > { %1637 = vrot.lane.b32.xlu0 %v3197_v55, %s2885_s1  ;;  %v2556_v55 = vpack.c.bf16 %v1659_v53, %v1658_v52  ;;  %v2297_v53 = vld [vmem:[%s3446_s13] ss:$0 sm:$0xff] }
 0x6fa   : > { %v1535_v33 = vpop.xlane.xlu0 %1534 }
 0x6fb   : > { %2762 = vrcp.f32 %v1535_v33  ;;  %v1532_v34 = vpop.xlane.xlu1 %1531  ;;  %v2568_v33 = vpack.c.bf16 %v1799_v32, %v1798_v31 }
 0x6fc   : > { %2764 = vrcp.f32 %v1532_v34  ;;  %v1898_v34 = vld [vmem:[%s3095_s28] sm:$0xff] }
 0x6fd   : > { %2569 = vmatprep.subr.bf16.mxu1 %v2568_v33 }
 0x6fe   : > { %v2722_v35 = vpop.permute.xlu0 %2721  ;;  %2571 = vmatpush3.bf16.msra.mxu1 %v2568_v33 }
 0x6ff   : > { %v2724_v36 = vunpack.i.h.bf16 %v2722_v35  ;;  %v2723_v37 = vunpack.i.l.bf16 %v2722_v35  ;;  %v2727_v38 = vpop.permute.xlu1 %2726  ;;  %v1899_v35 = vld [vmem:[%s3095_s28 + $0x8] sm:$0xff] }
 0x700   : > { %v2729_v39 = vunpack.i.h.bf16 %v2727_v38  ;;  %v2728_v41 = vunpack.i.l.bf16 %v2727_v38  ;;  %v1901_v38 = vld [vmem:[%s3095_s28 + $0x18] sm:$0xff] }
 0x701   : > { %v2532_v42 = vpack.c.bf16 %v2724_v36, %v2723_v37  ;;  %v1900_v36 = vld [vmem:[%s3095_s28 + $0x10] sm:$0xff]  ;;  %v2572_v37 = vpack.c.bf16 %v1899_v35, %v1898_v34 }
 0x702   : > { %v2552_v40 = vpack.c.bf16 %v2729_v39, %v2728_v41  ;;  %v1638_v63 = vpop.permute.xlu0 %1637  ;;  %v2576_v39 = vpack.c.bf16 %v1901_v38, %v1900_v36  ;;  %v1902_v41 = vld [vmem:[%s3095_s28 + $0x20] sm:$0xff] }
 0x703   : > { %2533 = vmatprep.subr.bf16.mxu0 %v2532_v42 }
 0x704   : > { %2535 = vmatpush3.bf16.msra.mxu0 %v2532_v42  ;;  %v1903_v42 = vld [vmem:[%s3095_s28 + $0x28] sm:$0xff] }
 0x705   : > { %v2763_v44 = vpop.eup %2762  ;;  %2553 = vmatprep.subr.bf16.mxu0 %v2552_v40  ;;  %v2580_v43 = vpack.c.bf16 %v1903_v42, %v1902_v41 }
 0x706   : > { %v2765_v46 = vpop.eup %2764  ;;  %v1539_v49 = vmul.f32 %v2763_v44, %v2751_v21 }
 0x707   : > { %2421 = vmatmul.mubr.msk.f32.vlgmr.msra.gmra.mrb[2].mxu0 %vm917_vm4, %v1139_v45  ;;  %v1538_v48 = vmul.f32 %v2765_v46, %v2753_v22 }
 0x708   : > { %2555 = vmatpush3.bf16.msra.mxu0 %v2552_v40 }
 0x709   : > { %2448 = vmatprep.mubr.msk.f32.mxu0 %vm917_vm4, %v1538_v48  ;;  %2557 = vmatprep.subr.bf16.mxu0 %v2556_v55 }
 0x70b   : > { %2449 = vmatmul.mubr.msk.f32.vlgmr.msra.gmra.mrb[4].mxu0 %vm917_vm4, %v1539_v49 }
 0x70c   : > { %2559 = vmatpush3.bf16.msra.mxu0 %v2556_v55 }
 0x70d   : > { %2561 = vmatprep.subr.bf16.mxu0 %v2560_v57 }
 0x710   : > { %2563 = vmatpush3.bf16.msra.mxu0 %v2560_v57 }
 0x711   : > { %2573 = vmatprep.subr.bf16.mxu0 %v2572_v37 }
 0x745   : > { %v2408_v50 = vpop.f32.mrb[0].mxu0 }
 0x746   : > { %v1018_v51 = vpop.f32.mrb[1].mxu0 }
 0x7da   : > { %v2422_v58 = vpop.f32.mrb[2].mxu0 }
 0x7db   : > { %v1218_v59 = vpop.f32.mrb[3].mxu0 }
 0x7dc   : > { %1629 = vrot.lane.b32.xlu1 %v1218_v59, %s2886_s18 }
 0x7de   : > { %v2450_v60 = vpop.f32.mrb[4].mxu0 }
 0x7df   : > { %v1618_v61 = vpop.f32.mrb[5].mxu0 }
 0x7e0   : > { %1631 = vrot.lane.b32.xlu1 %v2422_v58, %s2886_s18  ;;  %1645 = vrot.lane.b32.xlu0 %v1618_v61, %s2887_s29  ;;  %v1905_v61 = vld [vmem:[%s3095_s28 + $0x38] sm:$0xff] }
 0x7e4   : > { %1639 = vrot.lane.b32.xlu1 %v3195_v54, %s2885_s1 }
 0x7e8   : > { %1647 = vrot.lane.b32.xlu1 %v2450_v60, %s2887_s29  ;;  %v1904_v60 = vld [vmem:[%s3095_s28 + $0x30] sm:$0xff]  ;;  %s3449_s29 = sld [smem:[#allocation24_spill]] (!%p2302_p1) }
 0x84e   : > { %v1630_v1 = vpop.permute.xlu1 %1629 }
 0x84f   : > { %v1651_v4 = vsel %vm833_vm2, %v1018_v51, %v1630_v1  ;;  %v2296_v51 = vld [vmem:[%s663_s15] ss:$0 sm:$0xff] }
 0x850   : > { %v1653_v6 = vsel %vm917_vm4, %v1651_v4, %v1638_v63  ;;  %v2584_v63 = vpack.c.bf16 %v1905_v61, %v1904_v60  ;;  %v1906_v1 = vld [vmem:[%s3095_s28 + $0x40] sm:$0xff]  ;;  %v1907_v4 = vld [vmem:[%s3095_s28 + $0x48] sm:$0xff] }
 0x852   : > { %v1632_v5 = vpop.permute.xlu1 %1631  ;;  %v1646_v7 = vpop.permute.xlu0 %1645 }
 0x853   : > { %v1656_v8 = vsel %vm1655_vm5, %v1653_v6, %v1646_v7  ;;  %v1652_v0 = vsel %vm833_vm2, %v2408_v50, %v1632_v5  ;;  %v2588_v5 = vpack.c.bf16 %v1907_v4, %v1906_v1  ;;  %v1908_v6 = vld [vmem:[%s3095_s28 + $0x50] sm:$0xff]  ;;  %v1909_v7 = vld [vmem:[%s3095_s28 + $0x58] sm:$0xff] }
 0x854   : > { %2459 = vmatprep.mubr.msk.f32.mxu0 %vm696_vm1, %v1656_v8  ;;  %v2592_v8 = vpack.c.bf16 %v1909_v7, %v1908_v6 }
 0x856   : > { %v1640_v62 = vpop.permute.xlu1 %1639 }
 0x857   : > { %v1654_v9 = vsel %vm917_vm4, %v1652_v0, %v1640_v62  ;;  %v1910_v62 = vld [vmem:[%s3095_s28 + $0x60] sm:$0xff]  ;;  %v1911_v0 = vld [vmem:[%s3095_s28 + $0x68] sm:$0xff] }
 0x85a   : > { %v1648_v54 = vpop.permute.xlu1 %1647 }
 0x85b   : > { %v1657_v10 = vsel %vm1655_vm5, %v1654_v9, %v1648_v54  ;;  %v2596_v9 = vpack.c.bf16 %v1911_v0, %v1910_v62  ;;  %v1912_v54 = vld [vmem:[%s3095_s28 + $0x70] sm:$0xff] }
 0x85c   : > { %2460 = vmatmul.mubr.msk.f32.vlgmr.msra.gmra.mrb[6].mxu0 %vm696_vm1, %v1657_v10  ;;  %v1913_v10 = vld [vmem:[%s3095_s28 + $0x78] sm:$0xff] }
 0x85d   : > { %2575 = vmatpush3.bf16.msra.mxu0 %v2572_v37 }
 0x85e   : > { %2577 = vmatprep.subr.bf16.mxu0 %v2576_v39 }
 0x861   : > { %2579 = vmatpush3.bf16.msra.mxu0 %v2576_v39 }
 0x862   : > { %2581 = vmatprep.subr.bf16.mxu0 %v2580_v43 }
 0x865   : > { %2583 = vmatpush3.bf16.msra.mxu0 %v2580_v43 }
 0x866   : > { %2585 = vmatprep.subr.bf16.mxu0 %v2584_v63 }
 0x869   : > { %2587 = vmatpush3.bf16.msra.mxu0 %v2584_v63 }
 0x86a   : > { %2589 = vmatprep.subr.bf16.mxu0 %v2588_v5 }
 0x86d   : > { %2591 = vmatpush3.bf16.msra.mxu0 %v2588_v5 }
 0x86e   : > { %2593 = vmatprep.subr.bf16.mxu0 %v2592_v8 }
 0x871   : > { %2595 = vmatpush3.bf16.msra.mxu0 %v2592_v8 }
 0x872   : > { %2597 = vmatprep.subr.bf16.mxu0 %v2596_v9 }
 0x875   : > { %2599 = vmatpush3.bf16.msra.mxu0 %v2596_v9 }
 0x92f   : > { %v2461_v12 = vpop.f32.mrb[6].mxu0 }
 0x930   : > { %v1747_v13 = vadd.f32 %v2461_v12, %v2293_v11  ;;  %v1741_v14 = vpop.f32.mrb[7].mxu0  ;;  %v2298_v12 = vld [vmem:[%s674_s4] ss:$0 sm:$0xff] }
 0x931   : > { %v1742_v15 = vadd.f32 %v2293_v11, %v1741_v14  ;;  %v2600_v11 = vpack.c.bf16 %v1913_v10, %v1912_v54 }
 0x932   : > { %v3244_v16 = vadd.f32 %v1747_v13, %v3106_v3 }
 0x933   : > { %v3247_v17 = vadd.f32 %v1742_v15, %v3104_v2  ;;  %2601 = vmatprep.subr.bf16.mxu0 %v2600_v11 }
 0x934   : > { %v1757_v18 = vsel %vm696_vm1, %v3244_v16, 0.0  ;;  %2603 = vmatpush3.bf16.msra.mxu0 %v2600_v11 }
 0x935   : > { %1758 = vadd.xlane.f32.xlu1 %v1757_v18  ;;  %v1754_v19 = vsel %vm696_vm1, %v3247_v17, 0.0 }
 0x936   : > { %1755 = vadd.xlane.f32.xlu0 %v1754_v19 }
 0x9c2   : > { %v1759_v20 = vpop.xlane.xlu1 %1758 }
 0x9c3   : > { %v1761_v21 = vmul.f32 0.03125, %v1759_v20  ;;  %v1756_v22 = vpop.xlane.xlu0 %1755 }
 0x9c4   : > { %v1760_v3 = vmul.f32 0.03125, %v1756_v22 }
 0x9c5   : > { %v1763_v23 = vsub.f32 %v3244_v16, %v1761_v21 }
 0x9c6   : > { %v1762_v2 = vsub.f32 %v3247_v17, %v1760_v3 }
 0x9c7   : > { %v1765_v26 = vmul.f32 %v1763_v23, %v1763_v23 }
 0x9c8   : > { %v1764_v24 = vmul.f32 %v1762_v2, %v1762_v2 }
 0x9c9   : > { %v1769_v27 = vsel %vm696_vm1, %v1765_v26, 0.0 }
 0x9ca   : > { %v1766_v25 = vsel %vm696_vm1, %v1764_v24, 0.0 }
 0x9cb   : > { %1767 = vadd.xlane.f32.xlu0 %v1766_v25 }
 0x9cf   : > { %1770 = vadd.xlane.f32.xlu0 %v1769_v27  ;;  %v2301_v27 = vld [vmem:[%s682_s30] ss:$0 sm:$0xff] }
 0xa58   : > { %v1768_v40 = vpop.xlane.xlu0 %1767 }
 0xa59   : > { %v1772_v44 = vmul.f32 0.03125, %v1768_v40 }
 0xa5b   : > { %v1774_v45 = vadd.f32 1e-05, %v1772_v44 }
 0xa5c   : > { %v1771_v46 = vpop.xlane.xlu0 %1770 }
 0xa5d   : > { %2766 = vrsqrt.f32 %v1774_v45  ;;  %v1773_v48 = vmul.f32 0.03125, %v1771_v46 }
 0xa5f   : > { %v1775_v49 = vadd.f32 1e-05, %v1773_v48 }
 0xa61   : > { %2768 = vrsqrt.f32 %v1775_v49 }
 0xa67   : > { %v2767_v50 = vpop.eup %2766 }
 0xa68   : > { %v1778_v52 = vmul.f32 %v2767_v50, %v1762_v2 }
 0xa6a   : > { %v1786_v55 = vmul.f32 %v2296_v51, %v1778_v52  ;;  %v2303_v52 = vld [vmem:[%s3448_s14] ss:$0 sm:$0xff] (!%p2302_p1) }
 0xa6b   : > { %v2769_v47 = vpop.eup %2768 }
 0xa6c   : > { %v1779_v56 = vmul.f32 %v2769_v47, %v1763_v23  ;;  %v1794_v57 = vadd.f32 %v2297_v53, %v1786_v55  ;;  %v2304_v55 = vld [vmem:[%s3449_s29] ss:$0 sm:$0xff] (!%p2302_p1) }
 0xa6e   : > { %v1787_v58 = vmul.f32 %v2296_v51, %v1779_v56  ;;  %2470 = vmatprep.mubr.msk.f32.mxu1 %vm696_vm1, %v1794_v57 }
 0xa70   : > { %v1795_v59 = vadd.f32 %v2297_v53, %v1787_v58 }
 0xa72   : > { %2471 = vmatmul.mubr.msk.f32.vlgmr.msra.gmra.mrb[12].mxu1 %vm696_vm1, %v1795_v59 }
 0xb45   : > { %v2472_v13 = vpop.f32.mrb[12].mxu1 }
 0xb46   : > { %v1885_v14 = vadd.f32 %v2472_v13, %v2298_v12  ;;  %v1879_v15 = vpop.f32.mrb[13].mxu1 }
 0xb47   : > { %v1880_v18 = vadd.f32 %v2298_v12, %v1879_v15 }
 0xb48   : > { %v1891_v19 = vmul.f32 0.70710677, %v1885_v14  ;;  %v1889_v24 = vmul.f32 0.5, %v1885_v14 }
 0xb49   : > { %v1890_v20 = vmul.f32 0.70710677, %v1880_v18  ;;  %v1888_v23 = vmul.f32 0.5, %v1880_v18 }
 0xb4a   : > { %2770 = verf.f32 %v1891_v19 }
 0xb4b   : > { %2772 = verf.f32 %v1890_v20 }
 0xb54   : > { %v2771_v21 = vpop.eup %2770 }
 0xb55   : > { %v2773_v22 = vpop.eup %2772  ;;  %v1895_v3 = vadd.f32 1.0, %v2771_v21 }
 0xb56   : > { %v1894_v2 = vadd.f32 1.0, %v2773_v22 }
 0xb57   : > { %v1897_v26 = vmul.f32 %v1895_v3, %v1889_v24 }
 0xb58   : > { %v1896_v25 = vmul.f32 %v1894_v2, %v1888_v23 }
 0xb5a   : > { %2505 = vmatprep.mubr.f32.mxu0 %v1896_v25 }
 0xb5b   : > { %2506 = vmatmul.mubr.f32.vlgmr.msra.gmra.mrb[8].mxu0 %v1897_v26 }
 0xc2e   : > { %v2507_v28 = vpop.f32.mrb[8].mxu0  ;;  %2003 = sbr.rel (%p2302_p1) target bundleno = 3442 (0xd72), region = 88 }
 0xc2f   : > { %v1993_v29 = vadd.f32 %v2507_v28, %v2301_v27  ;;  %v1987_v30 = vpop.f32.mrb[9].mxu0 }
 0xc30   : > { %v1988_v31 = vadd.f32 %v2301_v27, %v1987_v30 }
 0xc31   : > { %v1997_v32 = vadd.f32 %v1993_v29, %v3244_v16 }
 0xc32   : > { %v1996_v33 = vadd.f32 %v1988_v31, %v3247_v17 }
 0xc33   : > { %1999 = vst.msk [vmem:[#allocation2 + $0x8] sm:$0xff] %vm696_vm1, %v1997_v32  ;;  %v2009_v35 = vsel (!%p2302_p1), %vm696_vm1, %v1997_v32, 0.0 }
 0xc34   : > { %1998 = vst.msk [vmem:[#allocation2] sm:$0xff] %vm696_vm1, %v1996_v33  ;;  %v2006_v34 = vsel (!%p2302_p1), %vm696_vm1, %v1996_v33, 0.0 }
 0xc35   : > { %2007 = vadd.xlane.f32.xlu0 %v2006_v34 }
 0xc39   : > { %2010 = vadd.xlane.f32.xlu0 %v2009_v35 }
 0xcc2   : > { %v2008_v36 = vpop.xlane.xlu0 %2007 }
 0xcc3   : > { %v2012_v37 = vmul.f32 0.03125, %v2008_v36 }
 0xcc5   : > { %v2014_v38 = vsub.f32 %v1996_v33, %v2012_v37 }
 0xcc6   : > { %v2011_v39 = vpop.xlane.xlu0 %2010 }
 0xcc7   : > { %v2013_v16 = vmul.f32 0.03125, %v2011_v39  ;;  %v2016_v41 = vmul.f32 %v2014_v38, %v2014_v38 }
 0xcc9   : > { %v2015_v17 = vsub.f32 %v1997_v32, %v2013_v16  ;;  %v2018_v42 = vsel %vm696_vm1, %v2016_v41, 0.0 }
 0xcca   : > { %2019 = vadd.xlane.f32.xlu1 %v2018_v42 }
 0xccb   : > { %v2017_v43 = vmul.f32 %v2015_v17, %v2015_v17 }
 0xccd   : > { %v2021_v40 = vsel %vm696_vm1, %v2017_v43, 0.0 }
 0xcce   : > { %2022 = vadd.xlane.f32.xlu1 %v2021_v40 }
 0xd57   : > { %v2020_v44 = vpop.xlane.xlu1 %2019 }
 0xd58   : > { %v2024_v45 = vmul.f32 0.03125, %v2020_v44 }
 0xd5a   : > { %v2026_v46 = vadd.f32 1e-05, %v2024_v45 }
 0xd5b   : > { %v2023_v48 = vpop.xlane.xlu1 %2022 }
 0xd5c   : > { %2774 = vrsqrt.f32 %v2026_v46  ;;  %v2025_v49 = vmul.f32 0.03125, %v2023_v48 }
 0xd5e   : > { %v2027_v50 = vadd.f32 1e-05, %v2025_v49 }
 0xd60   : > { %2776 = vrsqrt.f32 %v2027_v50 }
 0xd66   : > { %v2775_v51 = vpop.eup %2774 }
 0xd67   : > { %v2030_v53 = vmul.f32 %v2775_v51, %v2014_v38 }
 0xd69   : > { %v2038_v47 = vmul.f32 %v2303_v52, %v2030_v53 }
 0xd6a   : > { %v2777_v56 = vpop.eup %2776 }
 0xd6b   : > { %v2046_v57 = vadd.f32 %v2304_v55, %v2038_v47  ;;  %v2031_v58 = vmul.f32 %v2777_v56, %v2015_v17 }
 0xd6d   : > { %2048 = vst.msk [vmem:[%s3101_s25] sm:$0xff] %vm696_vm1, %v2046_v57  ;;  %v2039_v59 = vmul.f32 %v2303_v52, %v2031_v58 }
 0xd6f   : > { %v2047_v60 = vadd.f32 %v2304_v55, %v2039_v59 }
 0xd71   : > { %2049 = vst.msk [vmem:[%s3101_s25 + $0x8] sm:$0xff] %vm696_vm1, %v2047_v60 }
 0xd72 PF: > { %s3450_s21 = sld [smem:[#allocation10_spill]]  ;;  %s3451_s17 = sld [smem:[#allocation7_spill]] }
 0xd73   : > { %s3453_s20 = sld [smem:[#allocation25_spill]]  ;;  %s2064_s23 = sshll.u32 %s3101_s25, 4  ;;  %s3325_s23 = int_to_ptr.vmem [resolvable:$true] %s2064_s23 }
 0xd74   : > { %s2778_s24 = scalar_lea.vmem %s3325_s23, 256  ;;  %s2888_s16 = smov [#allocation3]  }
 0xd75   : > { %p2779_p2 = scmp.ne.s32.totalorder %s3325_s23, %s2778_s24  ;;  %s2782_s30 = sshll.u32 %s2888_s16, 4  ;;  %s2783_s30 = int_to_ptr.vmem [resolvable:$false] %s2782_s30 }
 0xd76   : > { %s2784_s14 = scalar_lea.vmem %s2783_s30, 512  ;;  %p2785_p6 = scmp.lt.s32.totalorder %s3325_s23, %s2783_s30 }
 0xd77   : > { %p2780_p4 = pnand %p2779_p2, %p3019_p3  ;;  %p2786_p7 = scmp.lt.s32.totalorder %s2784_s14, %s2778_s24 }
 0xd78   : > { %s2315_s0 = sshll.u32 %s3450_s21, 8  ;;  %s3455_s4 = sand.u32 1, %s3451_s17  }
 0xd79   : > { %s3454_s13 = smov %s3453_s20  ;;  %s3322_s15 = scalar_lea.hbm %s3453_s20, %s2315_s0 }
 0xd7a   : > { %s3329_s28 = scalar_lea.sflag [#allocation4], %s3455_s4  ;;  %p2781_p5 = pneg %p2780_p4 }
 0xd7b   : > { %p2787_p8 = por %p2786_p7, %p2785_p6 }
 0xd7d   : > { %p2788_p10 = pnand %p2787_p8, %p2781_p5 }
 0xd7f   : > { %2791 = shalt.err (!%p2788_p10)
}
 0xd80   : > { %s2792_s25 = scalar_lea.hbm %s3322_s15, 256  ;;  %s2796_s29 = scalar_lea.hbm %s3454_s13, 512 }
 0xd81   : > { %p2793_p11 = scmp.ne.s32.totalorder %s3322_s15, %s2792_s25  ;;  %p2797_p0 = scmp.lt.u32.totalorder %s3322_s15, %s3454_s13 }
 0xd82   : > { %p2798_p1 = scmp.lt.u32.totalorder %s2796_s29, %s2792_s25  ;;  %p2800_p4 = scmp.lt.u32.totalorder %s2792_s25, %s3322_s15 }
 0xd83   : > { %p2794_p12 = pnand %p2793_p11, %p3019_p3 }
 0xd84   : > { %p2799_p2 = por %p2798_p1, %p2797_p0 }
 0xd85   : > { %p2795_p13 = pneg %p2794_p12 }
 0xd86   : > { %p2801_p5 = por %p2800_p4, %p2799_p2 }
 0xd88   : > { %p2802_p6 = pnand %p2801_p5, %p2795_p13 }
 0xd8a   : > { %2805 = shalt.err (!%p2802_p6)
}
 0xd8b   : > { %s2889_s0 = smov 128  }
 0xd8c   : > { %2604 = dma.vmem_to_hbm [thread:$0]  (%p3019_p3), %s3325_s23, 256, %s3322_s15, %s3329_s28, %s2889_s0, %s2889_s0, %s2886_s18  }
 0xd8d PF: > { %s3456_s5 = sld [smem:[#allocation13_spill]]  ;;  %s3457_s19 = sld [smem:[#allocation6_spill]] }
 0xd93   : > { %p2610_p7 = scmp.ge.s32.totalorder %s3456_s5, 2  ;;  %s2079_s4 = sand.u32 1, %s3457_s19  }
 0xd94   : > { %s2080_s24 = scalar_lea.sflag [#allocation4], %s2079_s4 }
 0xd95   : > { %p2607_p8 = pnand %p2610_p7, %p3029_p9 }
 0xd97   : > { %2839 = dma.done.wait (!%p2607_p8), %s2080_s24, 256  }
 0xd98   : > { %2841 = vsyncadd (!%p2607_p8), %s2080_s24, 4294967040  ;;  %s28_s25 = sadd.s32 1, %s3456_s5   ;;  %s3459_s18 = sld [smem:[#allocation7_spill]] }
 0xd99   : > { %p25_p10 = scmp.ge.s32.totalorder %s28_s25, 8   ;;  %s3460_s19 = sld [smem:[#allocation8_spill]] }
 0xd9a   : > { %s3461_s20 = sld [smem:[#allocation18_spill]]  ;;  %s3462_s21 = sld [smem:[#allocation11_spill]] }
 0xd9b   : > { %s3463_s22 = sld [smem:[#allocation12_spill]]  ;;  %s3464_s23 = sld [smem:[#allocation14_spill]] }
 0xd9c   : > { %s3465_s24 = sld [smem:[#allocation16_spill]]  ;;  %27 = sbr.rel (!%p25_p10) target bundleno = 13 (0xd), region = 156 }
 0xda3   :  { %2085 = vsyncpa [#allocation4], 1 }
 0xda4   :  { %2087 = vsyncpa [#allocation4 + $0x1], 1 }

</bundles_post_ra>
